<compile_context>
chip_gen: v6e
topology: v6e:2x2x1
jax: 0.10.0
libtpu: 0.0.40
codegen_flags: <defaults>
</compile_context>

<pallas_src>
import jax
import jax.numpy as jnp
from jax.experimental import pallas as pl
from jax.experimental.pallas import tpu as pltpu

EPS = 1e-5                 # nn.BatchNorm3d default
USE_BF16_MATMUL = False    # bf16 operands: faster on all gens, but exceeds the 1e-4 check


def _round_up(x, m):
    return (x + m - 1) // m * m


def conv_bn_relu(x, weight, bias, gamma, beta):
    """x: (N, Cin, D, H, W) f32; weight: (Cout, Cin, 3, 3, 3); bias/gamma/beta: (Cout,)."""
    del bias  # cancels exactly under training-mode BN (batch mean is subtracted)
    N, Cin, D, H, W = x.shape
    Cout = weight.shape[0]
    Dp, Hp, Wp = D + 2, H + 2, W + 2
    S2 = Hp * Wp                     # flattened stride per depth plane
    L_valid = D * S2                 # lanes that can hold valid output voxels

    halo = 2 * S2 + 2 * Wp + 2       # largest tap offset
    HALO_C = _round_up(halo, 128)

    compute_dtype = jnp.bfloat16 if USE_BF16_MATMUL else jnp.float32
    itemsize = 2 if USE_BF16_MATMUL else 4

    # ---- chunk-size selection: C = k * HALO_C, sized for default scoped-VMEM limits ----
    # TODO(synk): for very large planes (HALO_C itself huge) a finer-than-2-plane chunking
    # scheme would be needed; k=1 is the floor here.
    k_cap = max(1, -(-L_valid // HALO_C))

    def _fits(kk):
        C_ = kk * HALO_C
        p1 = (2 * Cin * (C_ + HALO_C) + Cin * (C_ + HALO_C) + 27 * Cin * C_) * itemsize \
             + (2 * Cout * C_ + 2 * C_ + 2 * Cout * C_) * 4
        p2 = 4 * Cout * C_ * 4
        return p1 <= 10 * 2 ** 20 and p2 <= 10 * 2 ** 20

    k = k_cap
    while k > 1 and not _fits(k):
        k -= 1
    C = k * HALO_C
    NC = -(-L_valid // C)
    L_pad = NC * C
    LX = L_pad + HALO_C

    # ---- layout prep (cheap: pad + reshape, NO transpose, ~1x input size) ----
    x_flat = jnp.pad(x.astype(compute_dtype),
                     ((0, 0), (0, 0), (1, 1), (1, 1), (1, 1)))        # (N,Cin,Dp,Hp,Wp)
    x_flat = x_flat.reshape(N, Cin, Dp * S2)
    x_flat = jnp.pad(x_flat, ((0, 0), (0, 0), (0, LX - Dp * S2)))     # (N, Cin, LX)

    # weight (Cout,Cin,3,3,3) -> (Cout, 27*Cin); row order = (kd,kh,kw) outer, cin inner.
    w_flat = jnp.transpose(weight.astype(compute_dtype),
                           (0, 2, 3, 4, 1)).reshape(Cout, 27 * Cin)

    # validity mask over flattened lanes (junk rows/cols of the padded layout excluded)
    g = jnp.arange(L_pad, dtype=jnp.int32)
    d_i = g // S2
    rem = g - d_i * S2
    h_i = rem // Wp
    w_i = rem - h_i * Wp
    valid = (d_i < D) & (h_i < H) & (w_i < W)
    mask = valid.astype(jnp.float32).reshape(NC, 1, C)                # (NC, 1, C)
    counts = jnp.sum(mask, axis=(1, 2))                               # (NC,)

    tap_offsets = [kd * S2 + kh * Wp + kw
                   for kd in range(3) for kh in range(3) for kw in range(3)]

    # ---- pass 1: conv as ONE K=27*Cin matmul per chunk + merged per-chunk BN stats ----
    def conv_stats_kernel(xm_ref, xh_ref, w_ref, mask_ref, conv_ref, stats_ref,
                          xbuf, rhs):
        # xm_ref:   (1, Cin, C)        chunk c of the flattened padded volume
        # xh_ref:   (1, Cin, HALO_C)   halo = first HALO_C lanes of chunk c+1
        # w_ref:    (Cout, 27*Cin)     resident weights (one DMA total)
        # mask_ref: (1, 1, C)          validity mask for this chunk
        # conv_ref: (1, Cout, C)       lane-dense conv output
        # stats_ref:(1, 1, Cout, 2)    [...,0]=masked sum, [...,1]=chunk-centred sum of squares
        xbuf[:, :C] = xm_ref[0]
        xbuf[:, C:] = xh_ref[0]
        for j, off in enumerate(tap_offsets):                         # 27 static taps
            rhs[j * Cin:(j + 1) * Cin, :] = xbuf[:, off:off + C]
        conv = jnp.dot(w_ref[...], rhs[...],
                       preferred_element_type=jnp.float32)            # (Cout, C)
        conv_ref[0] = conv

        m = mask_ref[0]                                               # (1, C)
        cnt = jnp.sum(m, axis=1, keepdims=True)                       # (1, 1)
        csum = jnp.sum(conv * m, axis=1, keepdims=True)               # (Cout, 1)
        mu = csum / jnp.maximum(cnt, 1.0)
        dv = (conv - mu) * m
        m2 = jnp.sum(dv * dv, axis=1, keepdims=True)                  # (Cout, 1)
        stats_ref[0, 0, :, 0:1] = csum
        stats_ref[0, 0, :, 1:2] = m2

    conv_flat, stats = pl.pallas_call(
        conv_stats_kernel,
        out_shape=(jax.ShapeDtypeStruct((N, Cout, L_pad), jnp.float32),
                   jax.ShapeDtypeStruct((N, NC, Cout, 2), jnp.float32)),
        grid=(N, NC),
        in_specs=[
            pl.BlockSpec((1, Cin, C), lambda n, c: (n, 0, c)),
            pl.BlockSpec((1, Cin, HALO_C), lambda n, c: (n, 0, (c + 1) * k)),
            pl.BlockSpec((Cout, 27 * Cin), lambda n, c: (0, 0)),
            pl.BlockSpec((1, 1, C), lambda n, c: (c, 0, 0)),
        ],
        out_specs=(
            pl.BlockSpec((1, Cout, C), lambda n, c: (n, 0, c)),
            pl.BlockSpec((1, 1, Cout, 2), lambda n, c: (n, c, 0, 0)),
        ),
        scratch_shapes=[
            pltpu.VMEM((Cin, C + HALO_C), compute_dtype),
            pltpu.VMEM((27 * Cin, C), compute_dtype),
        ],
        compiler_params=pltpu.CompilerParams(
            dimension_semantics=("parallel", "parallel")),
    )(x_flat, x_flat, w_flat, mask)

    # ---- tiny JAX: Chan parallel-variance combine -> per-channel scale/shift ----
    csum = stats[..., 0]                                              # (N, NC, Cout)
    m2 = stats[..., 1]
    cnt = counts.reshape(1, NC, 1)
    total = jnp.float32(N * D * H * W)
    mean = jnp.sum(csum, axis=(0, 1)) / total                         # (Cout,)
    chunk_mean = csum / jnp.maximum(cnt, 1.0)
    var = (jnp.sum(m2, axis=(0, 1))
           + jnp.sum(cnt * jnp.square(chunk_mean - mean), axis=(0, 1))) / total
    var = jnp.maximum(var, 0.0)                                       # biased (training BN)
    s = gamma.astype(jnp.float32) * jax.lax.rsqrt(var + EPS)
    t = beta.astype(jnp.float32) - mean * s
    s2d = s.reshape(Cout, 1)
    t2d = t.reshape(Cout, 1)

    # ---- pass 2: streaming fused normalize + affine + ReLU over lane-dense blocks ----
    def bn_relu_kernel(c_ref, s_ref, t_ref, o_ref):
        o_ref[0] = jnp.maximum(c_ref[0] * s_ref[...] + t_ref[...], 0.0)

    y_flat = pl.pallas_call(
        bn_relu_kernel,
        out_shape=jax.ShapeDtypeStruct((N, Cout, L_pad), jnp.float32),
        grid=(N, NC),
        in_specs=[
            pl.BlockSpec((1, Cout, C), lambda n, c: (n, 0, c)),
            pl.BlockSpec((Cout, 1), lambda n, c: (0, 0)),
            pl.BlockSpec((Cout, 1), lambda n, c: (0, 0)),
        ],
        out_specs=pl.BlockSpec((1, Cout, C), lambda n, c: (n, 0, c)),
        compiler_params=pltpu.CompilerParams(
            dimension_semantics=("parallel", "parallel")),
    )(conv_flat, s2d, t2d)

    # ---- de-junk: single transpose-free slice+reshape; NCDHW falls out directly ----
    out = y_flat[:, :, :L_valid].reshape(N, Cout, D, Hp, Wp)[:, :, :, :H, :W]
    return out


def reference(x, weight, bias, gamma, beta):
    """Pure-JAX reference replicating the PyTorch forward (training-mode BN)."""
    conv = jax.lax.conv_general_dilated(
        x, weight, window_strides=(1, 1, 1),
        padding=((1, 1), (1, 1), (1, 1)),
        dimension_numbers=("NCDHW", "OIDHW", "NCDHW"))
    conv = conv + bias.reshape(1, -1, 1, 1, 1)
    mean = jnp.mean(conv, axis=(0, 2, 3, 4), keepdims=True)
    var = jnp.mean(jnp.square(conv - mean), axis=(0, 2, 3, 4), keepdims=True)
    y = (conv - mean) * jax.lax.rsqrt(var + EPS)
    y = y * gamma.reshape(1, -1, 1, 1, 1) + beta.reshape(1, -1, 1, 1, 1)
    return jnp.maximum(y, 0.0)


if __name__ == "__main__":
    N, Cin, Cout, D, H, W = 2, 4, 8, 8, 8, 8

    key = jax.random.PRNGKey(0)
    kx, kw, kb = jax.random.split(key, 3)

    x = jax.random.normal(kx, (N, Cin, D, H, W), dtype=jnp.float32)

    # Deterministic parameter init (shapes from nn.Conv3d / nn.BatchNorm3d).
    fan_in = Cin * 3 * 3 * 3
    bound = 1.0 / jnp.sqrt(jnp.float32(fan_in))
    weight = jax.random.uniform(kw, (Cout, Cin, 3, 3, 3), jnp.float32, -bound, bound)
    bias = jax.random.uniform(kb, (Cout,), jnp.float32, -bound, bound)
    gamma = jnp.ones((Cout,), jnp.float32)    # BatchNorm3d weight init
    beta = jnp.zeros((Cout,), jnp.float32)    # BatchNorm3d bias init

    out = jax.block_until_ready(conv_bn_relu(x, weight, bias, gamma, beta))
    ref = jax.block_until_ready(reference(x, weight, bias, gamma, beta))

    assert out.shape == (N, Cout, D, H, W)
    assert jnp.allclose(out, ref, atol=1e-4, rtol=1e-4), \
        float(jnp.max(jnp.abs(out - ref)))

    print("KERNEL_OK")
</pallas_src>

<mosaic_0001>
module attributes {stable_mosaic.version = 11 : i64} {
  func.func @conv_stats_kernel(%arg0: i32, %arg1: i32, %arg2: memref<1x4x1024xf32, #tpu.memory_space<vmem>>, %arg3: memref<1x4x256xf32, #tpu.memory_space<vmem>>, %arg4: memref<8x108xf32, #tpu.memory_space<vmem>>, %arg5: memref<1x1x1024xf32, #tpu.memory_space<vmem>>, %arg6: memref<1x8x1024xf32, #tpu.memory_space<vmem>>, %arg7: memref<1x1x8x2xf32, #tpu.memory_space<vmem>>, %arg8: memref<4x1280xf32, #tpu.memory_space<vmem>>, %arg9: memref<108x1024xf32, #tpu.memory_space<vmem>>) attributes {dimension_semantics = [#tpu.dimension_semantics<parallel>, #tpu.dimension_semantics<parallel>], iteration_bounds = array<i64: 2, 1>, scalar_prefetch = 0 : i64, scratch_operands = 2 : i64, tpu.core_type = #tpu.core_type<tc>, window_params = [{transform_indices = @transform_0, window_bounds = array<i64: 1, 4, 1024>}, {transform_indices = @transform_1, window_bounds = array<i64: 1, 4, 256>}, {pipeline_mode = #tpu.pipeline_mode<synchronous>, transform_indices = @transform_2, window_bounds = array<i64: 8, 108>}, {transform_indices = @transform_3, window_bounds = array<i64: 1, 1, 1024>}, {transform_indices = @transform_4, window_bounds = array<i64: 1, 8, 1024>}, {transform_indices = @transform_5, window_bounds = array<i64: 1, 1, 8, 2>}]} {
    %c0 = arith.constant 0 : index
    %c0_0 = arith.constant 0 : index
    %c0_1 = arith.constant 0 : index
    %0 = vector.load %arg2[%c0, %c0_0, %c0_1] : memref<1x4x1024xf32, #tpu.memory_space<vmem>>, vector<1x4x1024xf32>
    %1 = vector.shape_cast %0 : vector<1x4x1024xf32> to vector<4x1024xf32>
    %c0_2 = arith.constant 0 : index
    %c0_3 = arith.constant 0 : index
    %2 = vector.load %arg8[%c0_2, %c0_3] : memref<4x1280xf32, #tpu.memory_space<vmem>>, vector<4x1024xf32>
    tpu.vector_store %arg8[%c0_2, %c0_3], %1 {strides = array<i32>} : memref<4x1280xf32, #tpu.memory_space<vmem>>, vector<4x1024xf32>,
    %c0_4 = arith.constant 0 : index
    %c0_5 = arith.constant 0 : index
    %c0_6 = arith.constant 0 : index
    %3 = vector.load %arg3[%c0_4, %c0_5, %c0_6] : memref<1x4x256xf32, #tpu.memory_space<vmem>>, vector<1x4x256xf32>
    %4 = vector.shape_cast %3 : vector<1x4x256xf32> to vector<4x256xf32>
    %c0_7 = arith.constant 0 : index
    %c1024 = arith.constant 1024 : index
    %5 = vector.load %arg8[%c0_7, %c1024] : memref<4x1280xf32, #tpu.memory_space<vmem>>, vector<4x256xf32>
    tpu.vector_store %arg8[%c0_7, %c1024], %4 {strides = array<i32>} : memref<4x1280xf32, #tpu.memory_space<vmem>>, vector<4x256xf32>,
    %c0_8 = arith.constant 0 : index
    %c0_9 = arith.constant 0 : index
    %6 = vector.load %arg8[%c0_8, %c0_9] : memref<4x1280xf32, #tpu.memory_space<vmem>>, vector<4x1024xf32>
    %c0_10 = arith.constant 0 : index
    %c0_11 = arith.constant 0 : index
    %7 = vector.load %arg9[%c0_10, %c0_11] : memref<108x1024xf32, #tpu.memory_space<vmem>>, vector<4x1024xf32>
    tpu.vector_store %arg9[%c0_10, %c0_11], %6 {strides = array<i32>} : memref<108x1024xf32, #tpu.memory_space<vmem>>, vector<4x1024xf32>,
    %c0_12 = arith.constant 0 : index
    %c1 = arith.constant 1 : index
    %8 = vector.load %arg8[%c0_12, %c1] : memref<4x1280xf32, #tpu.memory_space<vmem>>, vector<4x1024xf32>
    %c4 = arith.constant 4 : index
    %c0_13 = arith.constant 0 : index
    %9 = vector.load %arg9[%c4, %c0_13] : memref<108x1024xf32, #tpu.memory_space<vmem>>, vector<4x1024xf32>
    tpu.vector_store %arg9[%c4, %c0_13], %8 {strides = array<i32>} : memref<108x1024xf32, #tpu.memory_space<vmem>>, vector<4x1024xf32>,
    %c0_14 = arith.constant 0 : index
    %c2 = arith.constant 2 : index
    %10 = vector.load %arg8[%c0_14, %c2] : memref<4x1280xf32, #tpu.memory_space<vmem>>, vector<4x1024xf32>
    %c8 = arith.constant 8 : index
    %c0_15 = arith.constant 0 : index
    %11 = vector.load %arg9[%c8, %c0_15] : memref<108x1024xf32, #tpu.memory_space<vmem>>, vector<4x1024xf32>
    tpu.vector_store %arg9[%c8, %c0_15], %10 {strides = array<i32>} : memref<108x1024xf32, #tpu.memory_space<vmem>>, vector<4x1024xf32>,
    %c0_16 = arith.constant 0 : index
    %c10 = arith.constant 10 : index
    %12 = vector.load %arg8[%c0_16, %c10] : memref<4x1280xf32, #tpu.memory_space<vmem>>, vector<4x1024xf32>
    %c12 = arith.constant 12 : index
    %c0_17 = arith.constant 0 : index
    %13 = vector.load %arg9[%c12, %c0_17] : memref<108x1024xf32, #tpu.memory_space<vmem>>, vector<4x1024xf32>
    tpu.vector_store %arg9[%c12, %c0_17], %12 {strides = array<i32>} : memref<108x1024xf32, #tpu.memory_space<vmem>>, vector<4x1024xf32>,
    %c0_18 = arith.constant 0 : index
    %c11 = arith.constant 11 : index
    %14 = vector.load %arg8[%c0_18, %c11] : memref<4x1280xf32, #tpu.memory_space<vmem>>, vector<4x1024xf32>
    %c16 = arith.constant 16 : index
    %c0_19 = arith.constant 0 : index
    %15 = vector.load %arg9[%c16, %c0_19] : memref<108x1024xf32, #tpu.memory_space<vmem>>, vector<4x1024xf32>
    tpu.vector_store %arg9[%c16, %c0_19], %14 {strides = array<i32>} : memref<108x1024xf32, #tpu.memory_space<vmem>>, vector<4x1024xf32>,
    %c0_20 = arith.constant 0 : index
    %c12_21 = arith.constant 12 : index
    %16 = vector.load %arg8[%c0_20, %c12_21] : memref<4x1280xf32, #tpu.memory_space<vmem>>, vector<4x1024xf32>
    %c20 = arith.constant 20 : index
    %c0_22 = arith.constant 0 : index
    %17 = vector.load %arg9[%c20, %c0_22] : memref<108x1024xf32, #tpu.memory_space<vmem>>, vector<4x1024xf32>
    tpu.vector_store %arg9[%c20, %c0_22], %16 {strides = array<i32>} : memref<108x1024xf32, #tpu.memory_space<vmem>>, vector<4x1024xf32>,
    %c0_23 = arith.constant 0 : index
    %c20_24 = arith.constant 20 : index
    %18 = vector.load %arg8[%c0_23, %c20_24] : memref<4x1280xf32, #tpu.memory_space<vmem>>, vector<4x1024xf32>
    %c24 = arith.constant 24 : index
    %c0_25 = arith.constant 0 : index
    %19 = vector.load %arg9[%c24, %c0_25] : memref<108x1024xf32, #tpu.memory_space<vmem>>, vector<4x1024xf32>
    tpu.vector_store %arg9[%c24, %c0_25], %18 {strides = array<i32>} : memref<108x1024xf32, #tpu.memory_space<vmem>>, vector<4x1024xf32>,
    %c0_26 = arith.constant 0 : index
    %c21 = arith.constant 21 : index
    %20 = vector.load %arg8[%c0_26, %c21] : memref<4x1280xf32, #tpu.memory_space<vmem>>, vector<4x1024xf32>
    %c28 = arith.constant 28 : index
    %c0_27 = arith.constant 0 : index
    %21 = vector.load %arg9[%c28, %c0_27] : memref<108x1024xf32, #tpu.memory_space<vmem>>, vector<4x1024xf32>
    tpu.vector_store %arg9[%c28, %c0_27], %20 {strides = array<i32>} : memref<108x1024xf32, #tpu.memory_space<vmem>>, vector<4x1024xf32>,
    %c0_28 = arith.constant 0 : index
    %c22 = arith.constant 22 : index
    %22 = vector.load %arg8[%c0_28, %c22] : memref<4x1280xf32, #tpu.memory_space<vmem>>, vector<4x1024xf32>
    %c32 = arith.constant 32 : index
    %c0_29 = arith.constant 0 : index
    %23 = vector.load %arg9[%c32, %c0_29] : memref<108x1024xf32, #tpu.memory_space<vmem>>, vector<4x1024xf32>
    tpu.vector_store %arg9[%c32, %c0_29], %22 {strides = array<i32>} : memref<108x1024xf32, #tpu.memory_space<vmem>>, vector<4x1024xf32>,
    %c0_30 = arith.constant 0 : index
    %c100 = arith.constant 100 : index
    %24 = vector.load %arg8[%c0_30, %c100] : memref<4x1280xf32, #tpu.memory_space<vmem>>, vector<4x1024xf32>
    %c36 = arith.constant 36 : index
    %c0_31 = arith.constant 0 : index
    %25 = vector.load %arg9[%c36, %c0_31] : memref<108x1024xf32, #tpu.memory_space<vmem>>, vector<4x1024xf32>
    tpu.vector_store %arg9[%c36, %c0_31], %24 {strides = array<i32>} : memref<108x1024xf32, #tpu.memory_space<vmem>>, vector<4x1024xf32>,
    %c0_32 = arith.constant 0 : index
    %c101 = arith.constant 101 : index
    %26 = vector.load %arg8[%c0_32, %c101] : memref<4x1280xf32, #tpu.memory_space<vmem>>, vector<4x1024xf32>
    %c40 = arith.constant 40 : index
    %c0_33 = arith.constant 0 : index
    %27 = vector.load %arg9[%c40, %c0_33] : memref<108x1024xf32, #tpu.memory_space<vmem>>, vector<4x1024xf32>
    tpu.vector_store %arg9[%c40, %c0_33], %26 {strides = array<i32>} : memref<108x1024xf32, #tpu.memory_space<vmem>>, vector<4x1024xf32>,
    %c0_34 = arith.constant 0 : index
    %c102 = arith.constant 102 : index
    %28 = vector.load %arg8[%c0_34, %c102] : memref<4x1280xf32, #tpu.memory_space<vmem>>, vector<4x1024xf32>
    %c44 = arith.constant 44 : index
    %c0_35 = arith.constant 0 : index
    %29 = vector.load %arg9[%c44, %c0_35] : memref<108x1024xf32, #tpu.memory_space<vmem>>, vector<4x1024xf32>
    tpu.vector_store %arg9[%c44, %c0_35], %28 {strides = array<i32>} : memref<108x1024xf32, #tpu.memory_space<vmem>>, vector<4x1024xf32>,
    %c0_36 = arith.constant 0 : index
    %c110 = arith.constant 110 : index
    %30 = vector.load %arg8[%c0_36, %c110] : memref<4x1280xf32, #tpu.memory_space<vmem>>, vector<4x1024xf32>
    %c48 = arith.constant 48 : index
    %c0_37 = arith.constant 0 : index
    %31 = vector.load %arg9[%c48, %c0_37] : memref<108x1024xf32, #tpu.memory_space<vmem>>, vector<4x1024xf32>
    tpu.vector_store %arg9[%c48, %c0_37], %30 {strides = array<i32>} : memref<108x1024xf32, #tpu.memory_space<vmem>>, vector<4x1024xf32>,
    %c0_38 = arith.constant 0 : index
    %c111 = arith.constant 111 : index
    %32 = vector.load %arg8[%c0_38, %c111] : memref<4x1280xf32, #tpu.memory_space<vmem>>, vector<4x1024xf32>
    %c52 = arith.constant 52 : index
    %c0_39 = arith.constant 0 : index
    %33 = vector.load %arg9[%c52, %c0_39] : memref<108x1024xf32, #tpu.memory_space<vmem>>, vector<4x1024xf32>
    tpu.vector_store %arg9[%c52, %c0_39], %32 {strides = array<i32>} : memref<108x1024xf32, #tpu.memory_space<vmem>>, vector<4x1024xf32>,
    %c0_40 = arith.constant 0 : index
    %c112 = arith.constant 112 : index
    %34 = vector.load %arg8[%c0_40, %c112] : memref<4x1280xf32, #tpu.memory_space<vmem>>, vector<4x1024xf32>
    %c56 = arith.constant 56 : index
    %c0_41 = arith.constant 0 : index
    %35 = vector.load %arg9[%c56, %c0_41] : memref<108x1024xf32, #tpu.memory_space<vmem>>, vector<4x1024xf32>
    tpu.vector_store %arg9[%c56, %c0_41], %34 {strides = array<i32>} : memref<108x1024xf32, #tpu.memory_space<vmem>>, vector<4x1024xf32>,
    %c0_42 = arith.constant 0 : index
    %c120 = arith.constant 120 : index
    %36 = vector.load %arg8[%c0_42, %c120] : memref<4x1280xf32, #tpu.memory_space<vmem>>, vector<4x1024xf32>
    %c60 = arith.constant 60 : index
    %c0_43 = arith.constant 0 : index
    %37 = vector.load %arg9[%c60, %c0_43] : memref<108x1024xf32, #tpu.memory_space<vmem>>, vector<4x1024xf32>
    tpu.vector_store %arg9[%c60, %c0_43], %36 {strides = array<i32>} : memref<108x1024xf32, #tpu.memory_space<vmem>>, vector<4x1024xf32>,
    %c0_44 = arith.constant 0 : index
    %c121 = arith.constant 121 : index
    %38 = vector.load %arg8[%c0_44, %c121] : memref<4x1280xf32, #tpu.memory_space<vmem>>, vector<4x1024xf32>
    %c64 = arith.constant 64 : index
    %c0_45 = arith.constant 0 : index
    %39 = vector.load %arg9[%c64, %c0_45] : memref<108x1024xf32, #tpu.memory_space<vmem>>, vector<4x1024xf32>
    tpu.vector_store %arg9[%c64, %c0_45], %38 {strides = array<i32>} : memref<108x1024xf32, #tpu.memory_space<vmem>>, vector<4x1024xf32>,
    %c0_46 = arith.constant 0 : index
    %c122 = arith.constant 122 : index
    %40 = vector.load %arg8[%c0_46, %c122] : memref<4x1280xf32, #tpu.memory_space<vmem>>, vector<4x1024xf32>
    %c68 = arith.constant 68 : index
    %c0_47 = arith.constant 0 : index
    %41 = vector.load %arg9[%c68, %c0_47] : memref<108x1024xf32, #tpu.memory_space<vmem>>, vector<4x1024xf32>
    tpu.vector_store %arg9[%c68, %c0_47], %40 {strides = array<i32>} : memref<108x1024xf32, #tpu.memory_space<vmem>>, vector<4x1024xf32>,
    %c0_48 = arith.constant 0 : index
    %c200 = arith.constant 200 : index
    %42 = vector.load %arg8[%c0_48, %c200] : memref<4x1280xf32, #tpu.memory_space<vmem>>, vector<4x1024xf32>
    %c72 = arith.constant 72 : index
    %c0_49 = arith.constant 0 : index
    %43 = vector.load %arg9[%c72, %c0_49] : memref<108x1024xf32, #tpu.memory_space<vmem>>, vector<4x1024xf32>
    tpu.vector_store %arg9[%c72, %c0_49], %42 {strides = array<i32>} : memref<108x1024xf32, #tpu.memory_space<vmem>>, vector<4x1024xf32>,
    %c0_50 = arith.constant 0 : index
    %c201 = arith.constant 201 : index
    %44 = vector.load %arg8[%c0_50, %c201] : memref<4x1280xf32, #tpu.memory_space<vmem>>, vector<4x1024xf32>
    %c76 = arith.constant 76 : index
    %c0_51 = arith.constant 0 : index
    %45 = vector.load %arg9[%c76, %c0_51] : memref<108x1024xf32, #tpu.memory_space<vmem>>, vector<4x1024xf32>
    tpu.vector_store %arg9[%c76, %c0_51], %44 {strides = array<i32>} : memref<108x1024xf32, #tpu.memory_space<vmem>>, vector<4x1024xf32>,
    %c0_52 = arith.constant 0 : index
    %c202 = arith.constant 202 : index
    %46 = vector.load %arg8[%c0_52, %c202] : memref<4x1280xf32, #tpu.memory_space<vmem>>, vector<4x1024xf32>
    %c80 = arith.constant 80 : index
    %c0_53 = arith.constant 0 : index
    %47 = vector.load %arg9[%c80, %c0_53] : memref<108x1024xf32, #tpu.memory_space<vmem>>, vector<4x1024xf32>
    tpu.vector_store %arg9[%c80, %c0_53], %46 {strides = array<i32>} : memref<108x1024xf32, #tpu.memory_space<vmem>>, vector<4x1024xf32>,
    %c0_54 = arith.constant 0 : index
    %c210 = arith.constant 210 : index
    %48 = vector.load %arg8[%c0_54, %c210] : memref<4x1280xf32, #tpu.memory_space<vmem>>, vector<4x1024xf32>
    %c84 = arith.constant 84 : index
    %c0_55 = arith.constant 0 : index
    %49 = vector.load %arg9[%c84, %c0_55] : memref<108x1024xf32, #tpu.memory_space<vmem>>, vector<4x1024xf32>
    tpu.vector_store %arg9[%c84, %c0_55], %48 {strides = array<i32>} : memref<108x1024xf32, #tpu.memory_space<vmem>>, vector<4x1024xf32>,
    %c0_56 = arith.constant 0 : index
    %c211 = arith.constant 211 : index
    %50 = vector.load %arg8[%c0_56, %c211] : memref<4x1280xf32, #tpu.memory_space<vmem>>, vector<4x1024xf32>
    %c88 = arith.constant 88 : index
    %c0_57 = arith.constant 0 : index
    %51 = vector.load %arg9[%c88, %c0_57] : memref<108x1024xf32, #tpu.memory_space<vmem>>, vector<4x1024xf32>
    tpu.vector_store %arg9[%c88, %c0_57], %50 {strides = array<i32>} : memref<108x1024xf32, #tpu.memory_space<vmem>>, vector<4x1024xf32>,
    %c0_58 = arith.constant 0 : index
    %c212 = arith.constant 212 : index
    %52 = vector.load %arg8[%c0_58, %c212] : memref<4x1280xf32, #tpu.memory_space<vmem>>, vector<4x1024xf32>
    %c92 = arith.constant 92 : index
    %c0_59 = arith.constant 0 : index
    %53 = vector.load %arg9[%c92, %c0_59] : memref<108x1024xf32, #tpu.memory_space<vmem>>, vector<4x1024xf32>
    tpu.vector_store %arg9[%c92, %c0_59], %52 {strides = array<i32>} : memref<108x1024xf32, #tpu.memory_space<vmem>>, vector<4x1024xf32>,
    %c0_60 = arith.constant 0 : index
    %c220 = arith.constant 220 : index
    %54 = vector.load %arg8[%c0_60, %c220] : memref<4x1280xf32, #tpu.memory_space<vmem>>, vector<4x1024xf32>
    %c96 = arith.constant 96 : index
    %c0_61 = arith.constant 0 : index
    %55 = vector.load %arg9[%c96, %c0_61] : memref<108x1024xf32, #tpu.memory_space<vmem>>, vector<4x1024xf32>
    tpu.vector_store %arg9[%c96, %c0_61], %54 {strides = array<i32>} : memref<108x1024xf32, #tpu.memory_space<vmem>>, vector<4x1024xf32>,
    %c0_62 = arith.constant 0 : index
    %c221 = arith.constant 221 : index
    %56 = vector.load %arg8[%c0_62, %c221] : memref<4x1280xf32, #tpu.memory_space<vmem>>, vector<4x1024xf32>
    %c100_63 = arith.constant 100 : index
    %c0_64 = arith.constant 0 : index
    %57 = vector.load %arg9[%c100_63, %c0_64] : memref<108x1024xf32, #tpu.memory_space<vmem>>, vector<4x1024xf32>
    tpu.vector_store %arg9[%c100_63, %c0_64], %56 {strides = array<i32>} : memref<108x1024xf32, #tpu.memory_space<vmem>>, vector<4x1024xf32>,
    %c0_65 = arith.constant 0 : index
    %c222 = arith.constant 222 : index
    %58 = vector.load %arg8[%c0_65, %c222] : memref<4x1280xf32, #tpu.memory_space<vmem>>, vector<4x1024xf32>
    %c104 = arith.constant 104 : index
    %c0_66 = arith.constant 0 : index
    %59 = vector.load %arg9[%c104, %c0_66] : memref<108x1024xf32, #tpu.memory_space<vmem>>, vector<4x1024xf32>
    tpu.vector_store %arg9[%c104, %c0_66], %58 {strides = array<i32>} : memref<108x1024xf32, #tpu.memory_space<vmem>>, vector<4x1024xf32>,
    %c0_67 = arith.constant 0 : index
    %c0_68 = arith.constant 0 : index
    %60 = vector.load %arg4[%c0_67, %c0_68] : memref<8x108xf32, #tpu.memory_space<vmem>>, vector<8x108xf32>
    %c0_69 = arith.constant 0 : index
    %c0_70 = arith.constant 0 : index
    %61 = vector.load %arg9[%c0_69, %c0_70] : memref<108x1024xf32, #tpu.memory_space<vmem>>, vector<108x1024xf32>
    %cst = arith.constant dense<0.000000e+00> : vector<8x1024xf32>
    %62 = tpu.matmul %60, %61, %cst {dimension_numbers = #tpu.dot_dimension_numbers<[1], [0], [0], [1], [0, 0, 1, 1], [], []>} : vector<8x108xf32>, vector<108x1024xf32>, vector<8x1024xf32> -> vector<8x1024xf32>
    %c0_71 = arith.constant 0 : index
    %c0_72 = arith.constant 0 : index
    %c0_73 = arith.constant 0 : index
    %63 = vector.load %arg6[%c0_71, %c0_72, %c0_73] : memref<1x8x1024xf32, #tpu.memory_space<vmem>>, vector<1x8x1024xf32>
    %64 = vector.shape_cast %63 : vector<1x8x1024xf32> to vector<8x1024xf32>
    %65 = vector.shape_cast %62 : vector<8x1024xf32> to vector<1x8x1024xf32>
    tpu.vector_store %arg6[%c0_71, %c0_72, %c0_73], %65 {strides = array<i32>} : memref<1x8x1024xf32, #tpu.memory_space<vmem>>, vector<1x8x1024xf32>,
    %c0_74 = arith.constant 0 : index
    %c0_75 = arith.constant 0 : index
    %c0_76 = arith.constant 0 : index
    %66 = vector.load %arg5[%c0_74, %c0_75, %c0_76] : memref<1x1x1024xf32, #tpu.memory_space<vmem>>, vector<1x1x1024xf32>
    %67 = vector.shape_cast %66 : vector<1x1x1024xf32> to vector<1x1024xf32>
    %cst_77 = arith.constant dense<0.000000e+00> : vector<1xf32>
    %68 = vector.multi_reduction <add>, %67, %cst_77 [1] : vector<1x1024xf32> to vector<1xf32>
    %69 = vector.shape_cast %68 : vector<1xf32> to vector<1x1xf32>
    %70 = vector.broadcast %67 : vector<1x1024xf32> to vector<8x1024xf32>
    %71 = arith.mulf %62, %70 : vector<8x1024xf32>
    %cst_78 = arith.constant dense<0.000000e+00> : vector<8xf32>
    %72 = vector.multi_reduction <add>, %71, %cst_78 [1] : vector<8x1024xf32> to vector<8xf32>
    %73 = vector.shape_cast %72 : vector<8xf32> to vector<8x1xf32>
    %cst_79 = arith.constant 1.000000e+00 : f32
    %74 = vector.broadcast %cst_79 : f32 to vector<1x1xf32>
    %75 = arith.maximumf %69, %74 : vector<1x1xf32>
    %76 = vector.broadcast %75 : vector<1x1xf32> to vector<8x1xf32>
    %77 = arith.divf %73, %76 : vector<8x1xf32>
    %78 = vector.broadcast %77 : vector<8x1xf32> to vector<8x1024xf32>
    %79 = arith.subf %62, %78 : vector<8x1024xf32>
    %80 = vector.broadcast %67 : vector<1x1024xf32> to vector<8x1024xf32>
    %81 = arith.mulf %79, %80 : vector<8x1024xf32>
    %82 = arith.mulf %81, %81 : vector<8x1024xf32>
    %cst_80 = arith.constant dense<0.000000e+00> : vector<8xf32>
    %83 = vector.multi_reduction <add>, %82, %cst_80 [1] : vector<8x1024xf32> to vector<8xf32>
    %84 = vector.shape_cast %83 : vector<8xf32> to vector<8x1xf32>
    %c0_81 = arith.constant 0 : index
    %c0_82 = arith.constant 0 : index
    %c0_83 = arith.constant 0 : index
    %c0_84 = arith.constant 0 : index
    %85 = vector.load %arg7[%c0_81, %c0_82, %c0_83, %c0_84] : memref<1x1x8x2xf32, #tpu.memory_space<vmem>>, vector<1x1x8x1xf32>
    %86 = vector.shape_cast %85 : vector<1x1x8x1xf32> to vector<8x1xf32>
    %87 = vector.shape_cast %73 : vector<8x1xf32> to vector<1x1x8x1xf32>
    tpu.vector_store %arg7[%c0_81, %c0_82, %c0_83, %c0_84], %87 {strides = array<i32>} : memref<1x1x8x2xf32, #tpu.memory_space<vmem>>, vector<1x1x8x1xf32>,
    %c0_85 = arith.constant 0 : index
    %c0_86 = arith.constant 0 : index
    %c0_87 = arith.constant 0 : index
    %c1_88 = arith.constant 1 : index
    %88 = vector.load %arg7[%c0_85, %c0_86, %c0_87, %c1_88] : memref<1x1x8x2xf32, #tpu.memory_space<vmem>>, vector<1x1x8x1xf32>
    %89 = vector.shape_cast %88 : vector<1x1x8x1xf32> to vector<8x1xf32>
    %90 = vector.shape_cast %84 : vector<8x1xf32> to vector<1x1x8x1xf32>
    tpu.vector_store %arg7[%c0_85, %c0_86, %c0_87, %c1_88], %90 {strides = array<i32>} : memref<1x1x8x2xf32, #tpu.memory_space<vmem>>, vector<1x1x8x1xf32>,
    return
  }
  func.func @transform_0(%arg0: i32, %arg1: i32) -> (i32, i32, i32) {
    %c0_i32 = arith.constant 0 : i32
    %c0_i32_0 = arith.constant 0 : i32
    return %arg0, %c0_i32, %arg1 : i32, i32, i32
  }
  func.func @transform_1(%arg0: i32, %arg1: i32) -> (i32, i32, i32) {
    %c1_i32 = arith.constant 1 : i32
    %0 = arith.addi %arg1, %c1_i32 : i32
    %c4_i32 = arith.constant 4 : i32
    %1 = arith.muli %0, %c4_i32 : i32
    %c0_i32 = arith.constant 0 : i32
    %c0_i32_0 = arith.constant 0 : i32
    return %arg0, %c0_i32, %1 : i32, i32, i32
  }
  func.func @transform_2(%arg0: i32, %arg1: i32) -> (i32, i32) {
    %c0_i32 = arith.constant 0 : i32
    %c0_i32_0 = arith.constant 0 : i32
    %c0_i32_1 = arith.constant 0 : i32
    return %c0_i32, %c0_i32_0 : i32, i32
  }
  func.func @transform_3(%arg0: i32, %arg1: i32) -> (i32, i32, i32) {
    %c0_i32 = arith.constant 0 : i32
    %c0_i32_0 = arith.constant 0 : i32
    %c0_i32_1 = arith.constant 0 : i32
    return %arg1, %c0_i32, %c0_i32_0 : i32, i32, i32
  }
  func.func @transform_4(%arg0: i32, %arg1: i32) -> (i32, i32, i32) {
    %c0_i32 = arith.constant 0 : i32
    %c0_i32_0 = arith.constant 0 : i32
    return %arg0, %c0_i32, %arg1 : i32, i32, i32
  }
  func.func @transform_5(%arg0: i32, %arg1: i32) -> (i32, i32, i32, i32) {
    %c0_i32 = arith.constant 0 : i32
    %c0_i32_0 = arith.constant 0 : i32
    %c0_i32_1 = arith.constant 0 : i32
    return %arg0, %arg1, %c0_i32, %c0_i32_0 : i32, i32, i32, i32
  }
}

</mosaic_0001>

<bundles_post_ra>
// kernel: tpu_custom_call.1
= control target key start
LH: loop header
LB: loop body
LE: loop exit
PB: predicated region body
PF: predicated region fallthrough
CT: control target
= control target key end

     0   :  { %s4411_s0 = inlined_call_operand.hbm [shape: f32[2,4,1280], index: 0, kind: input, shape index: {}]   ;;  %s4412_s1 = inlined_call_operand.hbm [shape: f32[2,4,1280], index: 1, kind: input, shape index: {}]   ;;  %s4413_s2 = inlined_call_operand.hbm [shape: f32[8,108], index: 2, kind: input, shape index: {}]   ;;  %s4414_s3 = inlined_call_operand.hbm [shape: f32[1,1,1024], index: 3, kind: input, shape index: {}]   ;;  %s4415_s4 = inlined_call_operand.hbm [shape: f32[2,8,1024], index: 4, kind: output, shape index: {0}]   ;;  %s4416_s5 = inlined_call_operand.vmem [shape: f32[2,1,8,2], index: 5, kind: output, shape index: {1}]  }
   0x1   :  { %4445 = sst [smem:[#allocation21_spill]] %s4411_s0 }
   0x2   :  { %4446 = sst [smem:[#allocation22_spill]] %s4413_s2 }
   0x3   :  { %4447 = sst [smem:[#allocation23_spill]] %s4414_s3 }
   0x4   :  { %11 = vsyncpa [#allocation5], 0 }
   0x5   :  { %13 = vsyncpa [#allocation5 + $0x1], 0 }
   0x6   :  { %14 = vsyncpa [#allocation8], 0 }
   0x7   :  { %16 = vsyncpa [#allocation8 + $0x1], 0 }
   0x8   :  { %17 = vsyncpa [#allocation11], 0 }
   0x9   :  { %18 = vsyncpa [#allocation6], 0 }
   0xa   :  { %20 = vsyncpa [#allocation6 + $0x1], 0  ;;  %s3105_s18 = smov 0   ;;  %s3107_s19 = smov 0  }
   0xb   :  { %s3109_s20 = smov 0   ;;  %s3111_s21 = smov 0  }
   0xc   :  { %s3113_s22 = smov 0   ;;  %s3115_s23 = smov 0  }
   0xd LB: > { %4448 = sst [smem:[#allocation18_spill]] %s3037_s22  ;;  %s3136_s24 = sadd.s32 4294967295, %s3041_s23   ;;  %s3041_s23 = sphi %s3115_s23, %s26_s23   ;;  %s3037_s22 = sphi %s3113_s22, %s4520_s22   ;;  %s3033_s21 = sphi %s3111_s21, %s4519_s21   ;;  %s3029_s20 = sphi %s3109_s20, %s4523_s20   ;;  %s3025_s19 = sphi %s3107_s19, %s4522_s19   ;;  %s3021_s18 = sphi %s3105_s18, %s4521_s18  }
   0xe   : > { %s2648_s25 = sadd.s32 4294967294, %s3041_s23   ;;  %p60_p0 = scmp.ne.s32.totalorder %s3025_s19, %s3021_s18 }
   0xf   : > { %p4417_p1 = scmp.eq.s32.totalorder %s3136_s24, 0  ;;  %p171_p3 = scmp.eq.s32.totalorder %s2648_s25, 1 }
  0x10   : > { %p2649_p5 = scmp.ge.s32.totalorder %s3041_s23, 1  ;;  %p206_p7 = scmp.lt.s32.totalorder %s3041_s23, 3 }
  0x11   : > { %p3145_p4 = por %p4417_p1, %p60_p0  ;;  %p3150_p6 = por %p171_p3, %p60_p0 }
  0x12   : > { %p3155_p8 = pnand %p2649_p5, %p206_p7  ;;  %s3043_s29 = smov [#allocation9]  }
  0x13   : > { %s4449_s26 = scalar_select %p3145_p4, 1, 0 }
  0x14   : > { %s4450_s27 = scalar_select %p3150_p6, 1, 0 }
  0x15   : > { %s4451_s28 = scalar_select %p3155_p8, 1, 0 }
  0x16   : > { %s219_s30 = sshll.u32 %s3043_s29, 4  ;;  %p2697_p10 = pneg %p3155_p8  ;;  %s220_s30 = int_to_ptr.vmem [resolvable:$true] %s219_s30 }
  0x17   : > { %s3044_s6 = smov [#allocation10]   ;;  %s2851_s9 = scalar_lea.vmem %s220_s30, 128 }
  0x18   : > { %s233_s7 = sshll.u32 %s3044_s6, 4  ;;  %p3164_p11 = pnand %p2697_p10, %p4417_p1  ;;  %s234_s7 = int_to_ptr.vmem [resolvable:$true] %s233_s7 }
  0x19   : > { %p2852_p13 = scmp.ne.s32.totalorder %s220_s30, %s2851_s9  ;;  %p2859_p5 = scmp.lt.s32.totalorder %s220_s30, %s220_s30 }
  0x1a   : > { %p2842_p12 = pneg %p3164_p11  ;;  %p2860_p7 = scmp.lt.s32.totalorder %s2851_s9, %s2851_s9 }
  0x1c   : > { %p2854_p0 = pnand %p2852_p13, %p2842_p12  ;;  %p2861_p9 = por %p2860_p7, %p2859_p5 }
  0x1e   : > { %p2855_p3 = pneg %p2854_p0 }
  0x20   : > { %p2862_p2 = pnand %p2861_p9, %p2855_p3 }
  0x22   : > { %2865 = shalt.err (!%p2862_p2)
}
  0x23   : > { %s4453_s2 = sld [smem:[#allocation22_spill]]  ;;  %s2877_s12 = scalar_lea.vmem %s234_s7, 128 }
  0x24   : > { %p2878_p10 = scmp.ne.s32.totalorder %s234_s7, %s2877_s12  ;;  %p2885_p13 = scmp.lt.s32.totalorder %s234_s7, %s234_s7 }
  0x25   : > { %p2886_p0 = scmp.lt.s32.totalorder %s2877_s12, %s2877_s12 }
  0x26   : > { %p2880_p1 = pnand %p2878_p10, %p2842_p12 }
  0x27   : > { %p2887_p4 = por %p2886_p0, %p2885_p13 }
  0x28   : > { %p2881_p6 = pneg %p2880_p1 }
  0x29   : > { %2700 = dma.hbm_to_vmem [thread:$0]  (!%p3164_p11), %s4453_s2, 128, %s220_s30, [#allocation8]  }
  0x2a   : > { %p2888_p8 = pnand %p2887_p4, %p2881_p6 }
  0x2c   : > { %2891 = shalt.err (!%p2888_p8)
}
  0x2d   : > { %s4454_s3 = sld [smem:[#allocation23_spill]]  ;;  %s38_s15 = sadd.s32 1, %s3037_s22 }
  0x2e   : > { %s47_s16 = sadd.s32 1, %s3029_s20  ;;  %p40_p1 = scmp.ge.s32.totalorder %s38_s15, 2 }
  0x2f   : > { %p54_p2 = scmp.ne.s32.totalorder %s3029_s20, %s3025_s19  ;;  %p55_p4 = scmp.eq.s32.totalorder %s3041_s23, 0 }
  0x30   : > { %p2717_p6 = scmp.lt.s32.totalorder %s3041_s23, 2  ;;  %s4525_s15 = smov (%p40_p1, %s38_s15), 0 }
  0x31   : > { %4455 = sst [smem:[#allocation19_spill]] %s4525_s15  ;;  %p56_p8 = por %p55_p4, %p54_p2 }
  0x32   : > { %p4456_p9 = scmp.eq.s32.totalorder %s3136_s24, 1  ;;  %s42_s25 = ssub.s32 %s3037_s22, %s4525_s15 }
  0x33   : > { %2703 = dma.hbm_to_vmem [thread:$0]  (!%p3164_p11), %s4454_s3, 128, %s234_s7, [#allocation11]  }
  0x34   : > { %p3196_p12 = por %p4456_p9, %p54_p2  ;;  %s3203_s29 = sand.u32 1, %s3029_s20  }
  0x35   : > { %p45_p11 = scmp.eq.s32.totalorder %s42_s25, 0  ;;  %s2653_s30 = sshll.u32 %s3203_s29, 5 }
  0x36   : > { %s2682_s6 = smul.u32 640, %s3037_s22  ;;  %s4459_s0 = sld [smem:[#allocation21_spill]] }
  0x37   : > { %s3208_s7 = scalar_select %p45_p11, %s3029_s20, %s47_s16  }
  0x38   : > { %s248_s11 = scalar_lea.vmem [#allocation4], %s2653_s30  ;;  %p3215_p3 = pnand %p2717_p6, %p56_p8 }
  0x39   : > { %4458 = sst [smem:[#allocation20_spill]] %s3208_s7  ;;  %s264_s12 = sshll.u32 %s248_s11, 4  ;;  %s265_s12 = int_to_ptr.vmem [resolvable:$true] %s264_s12 }
  0x3a   : > { %s271_s14 = sand.u32 1, %s3041_s23   ;;  %s245_s25 = scalar_lea.sflag [#allocation5], %s3203_s29 }
  0x3b   : > { %p2894_p5 = pneg %p3215_p3  ;;  %s2905_s16 = scalar_lea.vmem %s265_s12, 512 }
  0x3c   : > { %s261_s10 = scalar_lea.hbm %s4459_s0, %s2682_s6  ;;  %p2906_p7 = scmp.ne.s32.totalorder %s265_s12, %s2905_s16 }
  0x3d   : > { %s3045_s30 = smov [#allocation4]  }
  0x3e   : > { %p2908_p10 = pnand %p2906_p7, %p2894_p5  ;;  %s2910_s8 = sshll.u32 %s3045_s30, 4  ;;  %s2911_s8 = int_to_ptr.vmem [resolvable:$false] %s2910_s8 }
  0x3f   : > { %s2912_s9 = scalar_lea.vmem %s2911_s8, 1024  ;;  %p2913_p0 = scmp.lt.s32.totalorder %s265_s12, %s2911_s8 }
  0x40   : > { %p2909_p13 = pneg %p2908_p10  ;;  %p2914_p1 = scmp.lt.s32.totalorder %s2912_s9, %s2905_s16 }
  0x42   : > { %p2915_p2 = por %p2914_p1, %p2913_p0 }
  0x44   : > { %p2916_p4 = pnand %p2915_p2, %p2909_p13 }
  0x46   : > { %2919 = shalt.err (!%p2916_p4)
}
  0x47   : > { %2707 = dma.hbm_to_vmem [thread:$0]  (!%p3215_p3), %s261_s10, 512, %s265_s12, %s245_s25  }
  0x48   : > { %s2655_s11 = sshll.u32 %s3203_s29, 3  ;;  %s2539_s3 = scalar_lea.hbm %s4412_s1, %s2682_s6 }
  0x49   : > { %s2540_s15 = scalar_lea.hbm %s2539_s3, 512  ;;  %s275_s22 = scalar_lea.vmem [#allocation7], %s2655_s11 }
  0x4a   : > { %s287_s30 = sshll.u32 %s275_s22, 4  ;;  %s272_s7 = scalar_lea.sflag [#allocation8], %s271_s14  ;;  %s288_s30 = int_to_ptr.vmem [resolvable:$true] %s287_s30 }
  0x4b   : > { %s2933_s8 = scalar_lea.vmem %s288_s30, 128  ;;  %s3046_s16 = smov [#allocation7]  }
  0x4c   : > { %p2934_p6 = scmp.ne.s32.totalorder %s288_s30, %s2933_s8  ;;  %s2938_s9 = sshll.u32 %s3046_s16, 4  ;;  %s2939_s9 = int_to_ptr.vmem [resolvable:$false] %s2938_s9 }
  0x4d   : > { %s2940_s10 = scalar_lea.vmem %s2939_s9, 256  ;;  %p2941_p11 = scmp.lt.s32.totalorder %s288_s30, %s2939_s9 }
  0x4e   : > { %p2936_p8 = pnand %p2934_p6, %p2894_p5  ;;  %p2942_p7 = scmp.lt.s32.totalorder %s2940_s10, %s2933_s8 }
  0x50   : > { %p2937_p9 = pneg %p2936_p8  ;;  %p2943_p10 = por %p2942_p7, %p2941_p11 }
  0x52   : > { %p2944_p13 = pnand %p2943_p10, %p2937_p9 }
  0x54   : > { %2947 = shalt.err (!%p2944_p13)
}
  0x55   : > { %2710 = dma.hbm_to_vmem [thread:$0]  (!%p3215_p3), %s2540_s15, 128, %s288_s30, %s272_s7  }
  0x56   : > { %p4461_p0 = scmp.ne.s32.totalorder %s4451_s28, 0 }
  0x57   : > { %s3240_s0 = sand.u32 (!%p4461_p0), 1, %s3025_s19   ;;  %p4462_p5 = scmp.ne.s32.totalorder (!%p4461_p0), %s4449_s26, 0 }
  0x58   : > { %296 = sbr.rel (%p4461_p0) target bundleno = 1202 (0x4b2), region = 36  ;;  %s2658_s2 = sshll.u32 (!%p4461_p0), %s3240_s0, 5 }
  0x59   : > { %s299_s3 = scalar_lea.sflag (!%p4461_p0), [#allocation5], %s3240_s0  ;;  %s302_s22 = scalar_lea.vmem (!%p4461_p0), [#allocation4], %s2658_s2 }
  0x5d   : > { %3000 = dma.done.wait (%p4462_p5), %s299_s3, 512  }
  0x5e   : > { %3002 = vsyncadd (%p4462_p5), %s299_s3, 4294966784  ;;  %s307_s15 = sand.u32 1, %s3136_s24   ;;  %s2659_s28 = sshll.u32 %s3240_s0, 3 }
  0x5f   : > { %s308_s29 = scalar_lea.sflag [#allocation8], %s307_s15  ;;  %s3250_s6 = scalar_lea.vmem [#allocation7], %s2659_s28 }
  0x60   : > { %3004 = dma.done.wait (%p4462_p5), %s308_s29, 128  }
  0x61   : > { %3006 = vsyncadd (%p4462_p5), %s308_s29, 4294967168  ;;  %p4463_p3 = scmp.eq.s32.totalorder %s3136_s24, 0 }
  0x63   : > { %3008 = dma.done.wait (%p4463_p3), [#allocation8], 128   ;;  %p4464_p1 = pmov %p4463_p3 }
  0x65   : > { %3010 = vsyncadd (%p4464_p1), [#allocation8], 4294967168  ;;  %p4465_p2 = pmov %p4464_p1 }
  0x66   : > { %p4466_p4 = pmov %p4464_p1 }
  0x67   : > { %3012 = dma.done.wait (%p4465_p2), [#allocation11], 128  }
  0x68   : > { %3014 = vsyncadd (%p4466_p4), [#allocation11], 4294967168  ;;  %v3264_v0 = vld [vmem:[%s302_s22 + $0x8] sm:$0xff]  ;;  %v3266_v1 = vld [vmem:[%s302_s22 + $0x10] sm:$0xff]  ;;  %s3047_s26 = smov 34   ;;  %s3048_s24 = smov 36  }
  0x69   : > { %v3268_v2 = vld [vmem:[%s302_s22] sm:$0xff]  ;;  %379 = vst [vmem:[#allocation2 + $0x8] sm:$0xff] %v3264_v0  ;;  %380 = vst [vmem:[#allocation2 + $0x10] sm:$0xff] %v3266_v1  ;;  %v377_v3 = vld [vmem:[%s302_s22 + $0x18] sm:$0xff]  ;;  %s3049_s7 = smov 35   ;;  %s3050_s12 = smov 45   ;;  %v3342_v13 = vcombine.low %v3264_v0, %v3264_v0  ;;  %v3385_v18 = vcombine.high %v3264_v0, %v3264_v0  ;;  %v3406_v26 = vcombine.low %v3266_v1, %v3266_v1 }
  0x6a   : > { %378 = vst [vmem:[#allocation2] sm:$0xff] %v3268_v2  ;;  %381 = vst [vmem:[#allocation2 + $0x18] sm:$0xff] %v377_v3  ;;  %s3051_s13 = smov 44   ;;  %s3052_s14 = smov 54   ;;  %v3331_v12 = vcombine.high %v3268_v2, %v3268_v2  ;;  %v3353_v14 = vcombine.low %v3268_v2, %v3268_v2  ;;  %vm1878_vm0 = vcmask 277504   ;;  %v382_v21 = vld [vmem:[%s3250_s6] sm:$0xff] }
  0x6b   : > { %s3053_s25 = smov 46   ;;  %s3054_s11 = smov 56   ;;  %383 = vst [vmem:[#allocation2 + $0x20] sm:$0xff] %v382_v21  ;;  %vm1821_vm1 = vcmask 285696   ;;  %vm1763_vm2 = vcmask 293888   ;;  %vm2019_vm3 = vcmask 1043456  }
  0x6c   : > { %s3055_s30 = smov 55   ;;  %s3056_s8 = smov 7   ;;  %vm1648_vm4 = vcmask 367616   ;;  %vm1706_vm5 = vcmask 359424   ;;  %vm1533_vm6 = vcmask 441344   ;;  %vm1591_vm7 = vcmask 375808  }
  0x6d   : > { %s3057_s16 = smov 6   ;;  %s3058_s9 = smov 16   ;;  %vm1418_vm8 = vcmask 457728   ;;  %vm1476_vm9 = vcmask 449536   ;;  %vm4435_vm10 = vcmask 56320   ;;  %vm4434_vm11 = vcmask 48128  }
  0x6e   : > { %s3059_s10 = smov 8   ;;  %s3060_s2 = smov 18   ;;  %vm4437_vm12 = vcmask 130048   ;;  %vm4436_vm13 = vcmask 64512   ;;  %vm4439_vm14 = vcmask 146432   ;;  %vm4438_vm15 = vcmask 138240  }
  0x6f   : > { %s4422_s3 = smov 17   ;;  %s4424_s22 = smov 27  }
  0x70   : > { %v3273_v4 = vld [vmem:[#allocation2 + $0xc] sm:$0xff]  ;;  %s4426_s15 = smov 26   ;;  %s4428_s28 = smov 106  }
  0x71   : > { %v1846_v5 = vld [vmem:[#allocation2 + $0x4] sm:$0xff]  ;;  %1864 = vrot.lane.b32.xlu0 %v3273_v4, %s3047_s26  ;;  %v1799_v7 = vcombine.low %v3273_v4, %v3273_v4  ;;  %v1857_v9 = vcombine.high %v3273_v4, %v3273_v4  ;;  %v3296_v10 = vld [vmem:[#allocation2 + $0x14] sm:$0xff]  ;;  %s4430_s29 = smov 28   ;;  %s3066_s6 = smov 108  }
  0x72   : > { %1860 = vrot.lane.b32.xlu1 %v1846_v5, %s3047_s26  ;;  %v1856_v6 = vcombine.high %v1846_v5, %v1846_v5  ;;  %v1798_v8 = vcombine.low %v1846_v5, %v1846_v5  ;;  %v1800_v11 = vcombine.low %v3296_v10, %v3296_v10  ;;  %v3373_v15 = vld [vmem:[#allocation2 + $0x8] sm:$0xff]  ;;  %p367_p6 = scmp.lt.s32.totalorder %s3033_s21, 1 }
  0x73   : > { %402 = vst [vmem:[#allocation3 + $0x10] sm:$0xf] %v3373_v15 }
  0x75   : > { %1749 = vrot.lane.b32.xlu0 %v3273_v4, %s3048_s24 }
  0x76   : > { %1805 = vrot.lane.b32.xlu1 %v1846_v5, %s3049_s7 }
  0x79   : > { %1862 = vrot.lane.b32.xlu0 %v1856_v6, %s3047_s26 }
  0x7a   : > { %1745 = vrot.lane.b32.xlu1 %v1846_v5, %s3048_s24 }
  0x7d   : > { %1807 = vrot.lane.b32.xlu0 %v1799_v7, %s3049_s7 }
  0x7e   : > { %1747 = vrot.lane.b32.xlu1 %v1856_v6, %s3048_s24 }
  0x81   : > { %1803 = vrot.lane.b32.xlu0 %v1798_v8, %s3049_s7 }
  0x82   : > { %1632 = vrot.lane.b32.xlu1 %v1856_v6, %s3050_s12 }
  0x85   : > { %1634 = vrot.lane.b32.xlu0 %v3273_v4, %s3050_s12 }
  0x86   : > { %1690 = vrot.lane.b32.xlu1 %v1846_v5, %s3051_s13 }
  0x89   : > { %1692 = vrot.lane.b32.xlu0 %v1799_v7, %s3051_s13 }
  0x8a   : > { %1866 = vrot.lane.b32.xlu1 %v1857_v9, %s3047_s26 }
  0x8d   : > { %1868 = vrot.lane.b32.xlu0 %v3296_v10, %s3047_s26 }
  0x8e   : > { %1630 = vrot.lane.b32.xlu1 %v1846_v5, %s3050_s12 }
  0x91   : > { %1688 = vrot.lane.b32.xlu0 %v1798_v8, %s3051_s13 }
  0x92   : > { %1517 = vrot.lane.b32.xlu1 %v1856_v6, %s3052_s14 }
  0x95   : > { %1519 = vrot.lane.b32.xlu0 %v3273_v4, %s3052_s14 }
  0x96   : > { %1575 = vrot.lane.b32.xlu1 %v1846_v5, %s3053_s25 }
  0x99   : > { %1577 = vrot.lane.b32.xlu0 %v1799_v7, %s3053_s25 }
  0x9a   : > { %1751 = vrot.lane.b32.xlu1 %v1857_v9, %s3048_s24 }
  0x9d   : > { %1753 = vrot.lane.b32.xlu0 %v3296_v10, %s3048_s24 }
  0x9e   : > { %1809 = vrot.lane.b32.xlu1 %v3273_v4, %s3049_s7 }
  0xa1   : > { %1811 = vrot.lane.b32.xlu0 %v1800_v11, %s3049_s7 }
  0xa2   : > { %1515 = vrot.lane.b32.xlu1 %v1846_v5, %s3052_s14 }
  0xa5   : > { %1573 = vrot.lane.b32.xlu0 %v1798_v8, %s3053_s25 }
  0xa6   : > { %1402 = vrot.lane.b32.xlu1 %v1856_v6, %s3054_s11 }
  0xa9   : > { %1404 = vrot.lane.b32.xlu0 %v3273_v4, %s3054_s11 }
  0xaa   : > { %1460 = vrot.lane.b32.xlu1 %v1846_v5, %s3055_s30 }
  0xad   : > { %1462 = vrot.lane.b32.xlu0 %v1799_v7, %s3055_s30 }
  0xae   : > { %1636 = vrot.lane.b32.xlu1 %v1857_v9, %s3050_s12 }
  0xb1   : > { %1638 = vrot.lane.b32.xlu0 %v3296_v10, %s3050_s12 }
  0xb2   : > { %1694 = vrot.lane.b32.xlu1 %v3273_v4, %s3051_s13 }
  0xb5   : > { %1696 = vrot.lane.b32.xlu0 %v1800_v11, %s3051_s13 }
  0xb6   : > { %1400 = vrot.lane.b32.xlu1 %v1846_v5, %s3054_s11 }
  0xb9   : > { %1458 = vrot.lane.b32.xlu0 %v1798_v8, %s3055_s30 }
  0xba   : > { %1287 = vrot.lane.b32.xlu1 %v3331_v12, %s3056_s8 }
  0xbd   : > { %1289 = vrot.lane.b32.xlu0 %v3264_v0, %s3056_s8 }
  0xbe   : > { %1345 = vrot.lane.b32.xlu1 %v3268_v2, %s3057_s16 }
  0xc1   : > { %1347 = vrot.lane.b32.xlu0 %v3342_v13, %s3057_s16 }
  0xc2   : > { %1521 = vrot.lane.b32.xlu1 %v1857_v9, %s3052_s14 }
  0xc5   : > { %1523 = vrot.lane.b32.xlu0 %v3296_v10, %s3052_s14 }
  0xc6   : > { %1579 = vrot.lane.b32.xlu1 %v3273_v4, %s3053_s25 }
  0xc9   : > { %1581 = vrot.lane.b32.xlu0 %v1800_v11, %s3053_s25 }
  0xca   : > { %1285 = vrot.lane.b32.xlu1 %v3268_v2, %s3056_s8 }
  0xcd   : > { %1343 = vrot.lane.b32.xlu0 %v3353_v14, %s3057_s16 }
  0xce   : > { %1172 = vrot.lane.b32.xlu1 %v3331_v12, %s3058_s9 }
  0xd1   : > { %1174 = vrot.lane.b32.xlu0 %v3264_v0, %s3058_s9 }
  0xd2   : > { %1230 = vrot.lane.b32.xlu1 %v3268_v2, %s3059_s10 }
  0xd5   : > { %1232 = vrot.lane.b32.xlu0 %v3342_v13, %s3059_s10 }
  0xd6   : > { %1406 = vrot.lane.b32.xlu1 %v1857_v9, %s3054_s11 }
  0xd9   : > { %1408 = vrot.lane.b32.xlu0 %v3296_v10, %s3054_s11 }
  0xda   : > { %1464 = vrot.lane.b32.xlu1 %v3273_v4, %s3055_s30 }
  0xdd   : > { %1466 = vrot.lane.b32.xlu0 %v1800_v11, %s3055_s30 }
  0xde   : > { %1170 = vrot.lane.b32.xlu1 %v3268_v2, %s3058_s9 }
  0xe1   : > { %1228 = vrot.lane.b32.xlu0 %v3353_v14, %s3059_s10 }
  0xe2   : > { %1057 = vrot.lane.b32.xlu1 %v3331_v12, %s3060_s2 }
  0xe3   : > { %v1865_v16 = vpop.permute.xlu0 %1864 }
  0xe4   : > { %v1861_v17 = vpop.permute.xlu1 %1860 }
  0xe5   : > { %1059 = vrot.lane.b32.xlu0 %v3264_v0, %s3060_s2 }
  0xe6   : > { %1115 = vrot.lane.b32.xlu1 %v3268_v2, %s4422_s3 }
  0xe7   : > { %v3391_v19 = vpop.permute.xlu0 %1749 }
  0xe8   : > { %v1806_v20 = vpop.permute.xlu1 %1805 }
  0xe9   : > { %1117 = vrot.lane.b32.xlu0 %v3342_v13, %s4422_s3 }
  0xea   : > { %1291 = vrot.lane.b32.xlu1 %v3385_v18, %s3056_s8 }
  0xeb   : > { %v1863_v22 = vpop.permute.xlu0 %1862 }
  0xec   : > { %v1746_v23 = vpop.permute.xlu1 %1745  ;;  %v1879_v24 = vsel %vm1878_vm0, %v1861_v17, %v1863_v22  ;;  %v1880_v25 = vsel %vm1878_vm0, %v1863_v22, %v1865_v16 }
  0xed   : > { %1895 = vst [vmem:[#allocation3 + $0x190] sm:$0xf] %v1879_v24  ;;  %1896 = vst [vmem:[#allocation3 + $0x220] sm:$0xf] %v1880_v25  ;;  %1293 = vrot.lane.b32.xlu0 %v3266_v1, %s3056_s8 }
  0xee   : > { %1349 = vrot.lane.b32.xlu1 %v3264_v0, %s3057_s16 }
  0xef   : > { %v3408_v27 = vpop.permute.xlu0 %1807 }
  0xf0   : > { %v1748_v28 = vpop.permute.xlu1 %1747  ;;  %v1823_v29 = vsel %vm1821_vm1, %v1806_v20, %v3408_v27 }
  0xf1   : > { %v1764_v30 = vsel %vm1763_vm2, %v1746_v23, %v1748_v28  ;;  %v1765_v31 = vsel %vm1763_vm2, %v1748_v28, %v3391_v19  ;;  %1839 = vst [vmem:[#allocation3 + $0x258] sm:$0xf0] %v1823_v29  ;;  %1351 = vrot.lane.b32.xlu0 %v3406_v26, %s3057_s16 }
  0xf2   : > { %1780 = vst [vmem:[#allocation3 + $0x240] sm:$0xf] %v1764_v30  ;;  %1781 = vst [vmem:[#allocation3 + $0x258] sm:$0xf] %v1765_v31  ;;  %1055 = vrot.lane.b32.xlu1 %v3268_v2, %s3060_s2 }
  0xf3   : > { %v1804_v32 = vpop.permute.xlu0 %1803 }
  0xf4   : > { %v1633_v33 = vpop.permute.xlu1 %1632  ;;  %v1822_v34 = vsel %vm1821_vm1, %v1804_v32, %v1806_v20  ;;  %v2009_v35 = vld [vmem:[#allocation3 + $0x220] sm:$0xf]  ;;  %v2008_v36 = vld [vmem:[#allocation3 + $0x190] sm:$0xf] }
  0xf5   : > { %1838 = vst [vmem:[#allocation3 + $0x240] sm:$0xf0] %v1822_v34  ;;  %2664 = vmatprep.subr.msk.mxu0 %vm2019_vm3, %v2009_v35  ;;  %1113 = vrot.lane.b32.xlu0 %v3353_v14, %s4422_s3 }
  0xf6   : > { %942 = vrot.lane.b32.xlu1 %v3331_v12, %s4424_s22  ;;  %2665 = vmatpush1.msk.msra.mxu0 %vm2019_vm3, %v2008_v36 }
  0xf7   : > { %v3426_v37 = vpop.permute.xlu0 %1634 }
  0xf8   : > { %v1691_v38 = vpop.permute.xlu1 %1690  ;;  %v1650_v39 = vsel %vm1648_vm4, %v1633_v33, %v3426_v37 }
  0xf9   : > { %v2001_v40 = vld [vmem:[#allocation3 + $0x258] sm:$0xff]  ;;  %1666 = vst [vmem:[#allocation3 + $0x168] sm:$0xf] %v1650_v39  ;;  %944 = vrot.lane.b32.xlu0 %v3264_v0, %s4424_s22 }
  0xfa   : > { %2050 = vmatprep.subr.mxu0 %v2001_v40  ;;  %1000 = vrot.lane.b32.xlu1 %v3268_v2, %s4426_s15 }
  0xfb   : > { %v3434_v41 = vpop.permute.xlu0 %1692 }
  0xfc   : > { %v1867_v42 = vpop.permute.xlu1 %1866  ;;  %v1708_v43 = vsel %vm1706_vm5, %v1691_v38, %v3434_v41  ;;  %v2000_v45 = vld [vmem:[#allocation3 + $0x240] sm:$0xff] }
  0xfd   : > { %v1881_v44 = vsel %vm1878_vm0, %v1865_v16, %v1867_v42  ;;  %1724 = vst [vmem:[#allocation3 + $0x168] sm:$0xf0] %v1708_v43  ;;  %2051 = vmatpush1.msra.mxu0 %v2000_v45  ;;  %1002 = vrot.lane.b32.xlu0 %v3342_v13, %s4426_s15 }
  0xfe   : > { %1897 = vst [vmem:[#allocation3 + $0x8] sm:$0xf] %v1881_v44  ;;  %1176 = vrot.lane.b32.xlu1 %v3385_v18, %s3058_s9 }
  0xff   : > { %v3443_v46 = vpop.permute.xlu0 %1868 }
 0x100   : > { %v1631_v47 = vpop.permute.xlu1 %1630  ;;  %v1882_v48 = vsel %vm1878_vm0, %v1867_v42, %v3443_v46 }
 0x101   : > { %v1649_v49 = vsel %vm1648_vm4, %v1631_v47, %v1633_v33  ;;  %1898 = vst [vmem:[#allocation3 + $0x18] sm:$0xf] %v1882_v48  ;;  %1178 = vrot.lane.b32.xlu0 %v3266_v1, %s3058_s9 }
 0x102   : > { %1665 = vst [vmem:[#allocation3 + $0x348] sm:$0xf] %v1649_v49  ;;  %1234 = vrot.lane.b32.xlu1 %v3264_v0, %s3059_s10 }
 0x103   : > { %v1689_v50 = vpop.permute.xlu0 %1688 }
 0x104   : > { %v1518_v51 = vpop.permute.xlu1 %1517  ;;  %v1707_v52 = vsel %vm1706_vm5, %v1689_v50, %v1691_v38  ;;  %v1993_v53 = vld [vmem:[#allocation3 + $0x168] sm:$0xff] }
 0x105   : > { %1723 = vst [vmem:[#allocation3 + $0x348] sm:$0xf0] %v1707_v52  ;;  %2052 = vmatprep.subr.mxu0 %v1993_v53  ;;  %1236 = vrot.lane.b32.xlu0 %v3406_v26, %s3059_s10  ;;  %v2010_v58 = vld [vmem:[#allocation3 + $0x8] sm:$0xf] }
 0x106   : > { %940 = vrot.lane.b32.xlu1 %v3268_v2, %s4424_s22 }
 0x107   : > { %v3457_v54 = vpop.permute.xlu0 %1519 }
 0x108   : > { %v1576_v55 = vpop.permute.xlu1 %1575  ;;  %v1535_v56 = vsel %vm1533_vm6, %v1518_v51, %v3457_v54  ;;  %v2011_v57 = vld [vmem:[#allocation3 + $0x18] sm:$0xf] }
 0x109   : > { %1551 = vst [vmem:[#allocation3 + $0x20] sm:$0xf] %v1535_v56  ;;  %2667 = vmatprep.subr.msk.mxu1 %vm2019_vm3, %v2011_v57  ;;  %998 = vrot.lane.b32.xlu0 %v3353_v14, %s4426_s15 }
 0x10a   : > { %827 = vrot.lane.b32.xlu1 %v3331_v12, %s4428_s28  ;;  %2668 = vmatpush1.msk.msra.mxu1 %vm2019_vm3, %v2010_v58 }
 0x10b   : > { %v3467_v59 = vpop.permute.xlu0 %1577 }
 0x10c   : > { %v1752_v60 = vpop.permute.xlu1 %1751  ;;  %v1593_v61 = vsel %vm1591_vm7, %v1576_v55, %v3467_v59  ;;  %v1992_v63 = vld [vmem:[#allocation3 + $0x348] sm:$0xff] }
 0x10d   : > { %v1766_v62 = vsel %vm1763_vm2, %v3391_v19, %v1752_v60  ;;  %1609 = vst [vmem:[#allocation3 + $0x20] sm:$0xf0] %v1593_v61  ;;  %2053 = vmatpush1.msra.mxu0 %v1992_v63  ;;  %829 = vrot.lane.b32.xlu0 %v3264_v0, %s4428_s28 }
 0x10e   : > { %1782 = vst [vmem:[#allocation3 + $0x1b8] sm:$0xf] %v1766_v62  ;;  %885 = vrot.lane.b32.xlu1 %v3268_v2, %s4430_s29 }
 0x10f   : > { %v3477_v3 = vpop.permute.xlu0 %1753 }
 0x110   : > { %v1810_v4 = vpop.permute.xlu1 %1809  ;;  %v1767_v5 = vsel %vm1763_vm2, %v1752_v60, %v3477_v3 }
 0x111   : > { %v1824_v6 = vsel %vm1821_vm1, %v3408_v27, %v1810_v4  ;;  %1783 = vst [vmem:[#allocation3 + $0x118] sm:$0xf] %v1767_v5  ;;  %887 = vrot.lane.b32.xlu0 %v3342_v13, %s4430_s29 }
 0x112   : > { %1840 = vst [vmem:[#allocation3 + $0x1b8] sm:$0xf0] %v1824_v6  ;;  %1061 = vrot.lane.b32.xlu1 %v3385_v18, %s3060_s2 }
 0x113   : > { %v3487_v7 = vpop.permute.xlu0 %1811 }
 0x114   : > { %v1516_v8 = vpop.permute.xlu1 %1515  ;;  %v1825_v9 = vsel %vm1821_vm1, %v1810_v4, %v3487_v7  ;;  %v1985_v16 = vld [vmem:[#allocation3 + $0x20] sm:$0xff] }
 0x115   : > { %v1534_v11 = vsel %vm1533_vm6, %v1516_v8, %v1518_v51  ;;  %1841 = vst [vmem:[#allocation3 + $0x118] sm:$0xf0] %v1825_v9  ;;  %2054 = vmatprep.subr.mxu0 %v1985_v16  ;;  %1063 = vrot.lane.b32.xlu0 %v3266_v1, %s3060_s2 }
 0x116   : > { %1550 = vst [vmem:[#allocation3 + $0x140] sm:$0xf] %v1534_v11  ;;  %1119 = vrot.lane.b32.xlu1 %v3264_v0, %s4422_s3 }
 0x117   : > { %v1574_v17 = vpop.permute.xlu0 %1573 }
 0x118   : > { %v1403_v19 = vpop.permute.xlu1 %1402  ;;  %v1592_v20 = vsel %vm1591_vm7, %v1574_v17, %v1576_v55 }
 0x119   : > { %1608 = vst [vmem:[#allocation3 + $0x140] sm:$0xf0] %v1592_v20  ;;  %1121 = vrot.lane.b32.xlu0 %v3406_v26, %s4422_s3  ;;  %v2002_v25 = vld [vmem:[#allocation3 + $0x1b8] sm:$0xff]  ;;  %s4432_s3 = smov 107  }
 0x11a   : > { %825 = vrot.lane.b32.xlu1 %v3268_v2, %s4428_s28 }
 0x11b   : > { %v3501_v21 = vpop.permute.xlu0 %1404 }
 0x11c   : > { %v1461_v22 = vpop.permute.xlu1 %1460  ;;  %v1420_v23 = vsel %vm1418_vm8, %v1403_v19, %v3501_v21  ;;  %v2003_v24 = vld [vmem:[#allocation3 + $0x118] sm:$0xff] }
 0x11d   : > { %1436 = vst [vmem:[#allocation3 + $0x210] sm:$0xf] %v1420_v23  ;;  %2121 = vmatprep.subr.mxu1 %v2003_v24  ;;  %883 = vrot.lane.b32.xlu0 %v3353_v14, %s4430_s29 }
 0x11e   : > { %712 = vrot.lane.b32.xlu1 %v3331_v12, %s3066_s6  ;;  %2122 = vmatpush1.msra.mxu1 %v2002_v25 }
 0x11f   : > { %v3509_v27 = vpop.permute.xlu0 %1462 }
 0x120   : > { %v1637_v28 = vpop.permute.xlu1 %1636  ;;  %v1478_v29 = vsel %vm1476_vm9, %v1461_v22, %v3509_v27  ;;  %v1984_v31 = vld [vmem:[#allocation3 + $0x140] sm:$0xff] }
 0x121   : > { %v1651_v30 = vsel %vm1648_vm4, %v3426_v37, %v1637_v28  ;;  %1494 = vst [vmem:[#allocation3 + $0x210] sm:$0xf0] %v1478_v29  ;;  %2055 = vmatpush1.msra.mxu0 %v1984_v31  ;;  %714 = vrot.lane.b32.xlu0 %v3264_v0, %s3066_s6  ;;  %v384_v31 = vld [vmem:[#allocation2] sm:$0xff] }
 0x122   : > { %1667 = vst [vmem:[#allocation3 + $0x288] sm:$0xf] %v1651_v30  ;;  %770 = vrot.lane.b32.xlu1 %v3268_v2, %s4432_s3  ;;  %400 = vst [vmem:[#allocation3 + $0x2b0] sm:$0xf] %v384_v31 }
 0x123   : > { %v3519_v32 = vpop.permute.xlu0 %1638 }
 0x124   : > { %v1695_v33 = vpop.permute.xlu1 %1694  ;;  %v1652_v34 = vsel %vm1648_vm4, %v1637_v28, %v3519_v32 }
 0x125   : > { %v1709_v35 = vsel %vm1706_vm5, %v3434_v41, %v1695_v33  ;;  %1668 = vst [vmem:[#allocation3 + $0x1d0] sm:$0xf] %v1652_v34  ;;  %772 = vrot.lane.b32.xlu0 %v3342_v13, %s4432_s3 }
 0x126   : > { %1725 = vst [vmem:[#allocation3 + $0x288] sm:$0xf0] %v1709_v35  ;;  %946 = vrot.lane.b32.xlu1 %v3385_v18, %s4424_s22 }
 0x127   : > { %v3529_v36 = vpop.permute.xlu0 %1696 }
 0x128   : > { %v1401_v37 = vpop.permute.xlu1 %1400  ;;  %v1710_v38 = vsel %vm1706_vm5, %v1695_v33, %v3529_v36  ;;  %v1977_v40 = vld [vmem:[#allocation3 + $0x210] sm:$0xff] }
 0x129   : > { %v1419_v39 = vsel %vm1418_vm8, %v1401_v37, %v1403_v19  ;;  %1726 = vst [vmem:[#allocation3 + $0x1d0] sm:$0xf0] %v1710_v38  ;;  %2056 = vmatprep.subr.mxu0 %v1977_v40  ;;  %948 = vrot.lane.b32.xlu0 %v3266_v1, %s4424_s22  ;;  %s3068_s22 = smov 117   ;;  %v392_v37 = vcombine.high %v384_v31, %v384_v31 }
 0x12a   : > { %1435 = vst [vmem:[#allocation3 + $0x30] sm:$0xf] %v1419_v39  ;;  %1004 = vrot.lane.b32.xlu1 %v3264_v0, %s4426_s15 }
 0x12b   : > { %v1459_v41 = vpop.permute.xlu0 %1458  ;;  %401 = vst [vmem:[#allocation3 + $0xd0] sm:$0xf] %v392_v37 }
 0x12c   : > { %v1288_v42 = vpop.permute.xlu1 %1287  ;;  %v1477_v43 = vsel %vm1476_vm9, %v1459_v41, %v1461_v22 }
 0x12d   : > { %1493 = vst [vmem:[#allocation3 + $0x30] sm:$0xf0] %v1477_v43  ;;  %1006 = vrot.lane.b32.xlu0 %v3406_v26, %s4426_s15  ;;  %v1994_v49 = vld [vmem:[#allocation3 + $0x288] sm:$0xff]  ;;  %s3069_s15 = smov 116  }
 0x12e   : > { %710 = vrot.lane.b32.xlu1 %v3268_v2, %s3066_s6 }
 0x12f   : > { %v3543_v44 = vpop.permute.xlu0 %1289 }
 0x130   : > { %v1346_v45 = vpop.permute.xlu1 %1345  ;;  %v1305_v47 = vsel %vm4435_vm10, %v1288_v42, %v3543_v44  ;;  %v1995_v48 = vld [vmem:[#allocation3 + $0x1d0] sm:$0xff] }
 0x131   : > { %1321 = vst [vmem:[#allocation3 + $0x370] sm:$0xf] %v1305_v47  ;;  %2123 = vmatprep.subr.mxu1 %v1995_v48  ;;  %768 = vrot.lane.b32.xlu0 %v3353_v14, %s4432_s3 }
 0x132   : > { %597 = vrot.lane.b32.xlu1 %v3331_v12, %s3068_s22  ;;  %2124 = vmatpush1.msra.mxu1 %v1994_v49 }
 0x133   : > { %v3551_v50 = vpop.permute.xlu0 %1347 }
 0x134   : > { %v1522_v51 = vpop.permute.xlu1 %1521  ;;  %v1363_v52 = vsel %vm4434_vm11, %v1346_v45, %v3551_v50  ;;  %v1976_v55 = vld [vmem:[#allocation3 + $0x30] sm:$0xff] }
 0x135   : > { %v1536_v53 = vsel %vm1533_vm6, %v3457_v54, %v1522_v51  ;;  %1379 = vst [vmem:[#allocation3 + $0x370] sm:$0xf0] %v1363_v52  ;;  %2057 = vmatpush1.msra.mxu0 %v1976_v55  ;;  %599 = vrot.lane.b32.xlu0 %v3264_v0, %s3068_s22 }
 0x136   : > { %1552 = vst [vmem:[#allocation3 + $0x68] sm:$0xf] %v1536_v53  ;;  %655 = vrot.lane.b32.xlu1 %v3268_v2, %s3069_s15 }
 0x137   : > { %v3561_v56 = vpop.permute.xlu0 %1523 }
 0x138   : > { %v1580_v57 = vpop.permute.xlu1 %1579  ;;  %v1537_v58 = vsel %vm1533_vm6, %v1522_v51, %v3561_v56 }
 0x139   : > { %v1594_v54 = vsel %vm1591_vm7, %v3467_v59, %v1580_v57  ;;  %1553 = vst [vmem:[#allocation3 + $0x78] sm:$0xf] %v1537_v58  ;;  %657 = vrot.lane.b32.xlu0 %v3342_v13, %s3069_s15 }
 0x13a   : > { %1610 = vst [vmem:[#allocation3 + $0x68] sm:$0xf0] %v1594_v54  ;;  %831 = vrot.lane.b32.xlu1 %v3385_v18, %s4428_s28 }
 0x13b   : > { %v3571_v60 = vpop.permute.xlu0 %1581 }
 0x13c   : > { %v1286_v61 = vpop.permute.xlu1 %1285  ;;  %v1595_v62 = vsel %vm1591_vm7, %v1580_v57, %v3571_v60  ;;  %v1969_v4 = vld [vmem:[#allocation3 + $0x370] sm:$0xff] }
 0x13d   : > { %v1304_v63 = vsel %vm4435_vm10, %v1286_v61, %v1288_v42  ;;  %1611 = vst [vmem:[#allocation3 + $0x78] sm:$0xf0] %v1595_v62  ;;  %2058 = vmatprep.subr.mxu0 %v1969_v4  ;;  %833 = vrot.lane.b32.xlu0 %v3266_v1, %s4428_s28  ;;  %s3070_s28 = smov 126  }
 0x13e   : > { %1320 = vst [vmem:[#allocation3 + $0x218] sm:$0xf] %v1304_v63  ;;  %889 = vrot.lane.b32.xlu1 %v3264_v0, %s4430_s29 }
 0x13f   : > { %v1344_v59 = vpop.permute.xlu0 %1343 }
 0x140   : > { %v1173_v5 = vpop.permute.xlu1 %1172  ;;  %v1362_v6 = vsel %vm4434_vm11, %v1344_v59, %v1346_v45  ;;  %v393_v59 = vcombine.high %v3373_v15, %v3373_v15 }
 0x141   : > { %1378 = vst [vmem:[#allocation3 + $0x218] sm:$0xf0] %v1362_v6  ;;  %891 = vrot.lane.b32.xlu0 %v3406_v26, %s4430_s29  ;;  %v1986_v17 = vld [vmem:[#allocation3 + $0x68] sm:$0xff]  ;;  %s3071_s29 = smov 118  }
 0x142   : > { %595 = vrot.lane.b32.xlu1 %v3268_v2, %s3068_s22  ;;  %403 = vst [vmem:[#allocation3 + $0x48] sm:$0xf] %v393_v59 }
 0x143   : > { %v3585_v8 = vpop.permute.xlu0 %1174 }
 0x144   : > { %v1231_v9 = vpop.permute.xlu1 %1230  ;;  %v1190_v11 = vsel %vm4437_vm12, %v1173_v5, %v3585_v8  ;;  %v1987_v16 = vld [vmem:[#allocation3 + $0x78] sm:$0xff] }
 0x145   : > { %1206 = vst [vmem:[#allocation3 + $0xf8] sm:$0xf] %v1190_v11  ;;  %2125 = vmatprep.subr.mxu1 %v1987_v16  ;;  %653 = vrot.lane.b32.xlu0 %v3353_v14, %s3069_s15  ;;  %v3681_v11 = vcombine.high %v3296_v10, %v3296_v10 }
 0x146   : > { %482 = vrot.lane.b32.xlu1 %v3331_v12, %s3070_s28  ;;  %2126 = vmatpush1.msra.mxu1 %v1986_v17  ;;  %v3688_v17 = vld [vmem:[#allocation2 + $0x1c] sm:$0xff] }
 0x147   : > { %v3593_v19 = vpop.permute.xlu0 %1232 }
 0x148   : > { %v1407_v20 = vpop.permute.xlu1 %1406  ;;  %v1248_v22 = vsel %vm4436_vm13, %v1231_v9, %v3593_v19  ;;  %v1968_v24 = vld [vmem:[#allocation3 + $0x218] sm:$0xff] }
 0x149   : > { %v1421_v23 = vsel %vm1418_vm8, %v3501_v21, %v1407_v20  ;;  %1264 = vst [vmem:[#allocation3 + $0xf8] sm:$0xf0] %v1248_v22  ;;  %2059 = vmatpush1.msra.mxu0 %v1968_v24  ;;  %484 = vrot.lane.b32.xlu0 %v3264_v0, %s3070_s28 }
 0x14a   : > { %1437 = vst [vmem:[#allocation3 + $0x1e0] sm:$0xf] %v1421_v23  ;;  %540 = vrot.lane.b32.xlu1 %v3268_v2, %s3071_s29 }
 0x14b   : > { %v3603_v12 = vpop.permute.xlu0 %1408 }
 0x14c   : > { %v1465_v25 = vpop.permute.xlu1 %1464  ;;  %v1422_v28 = vsel %vm1418_vm8, %v1407_v20, %v3603_v12  ;;  %v3073_v20 = vmov 0.0  }
 0x14d   : > { %v1479_v21 = vsel %vm1476_vm9, %v3509_v27, %v1465_v25  ;;  %1438 = vst [vmem:[#allocation3 + $0x50] sm:$0xf] %v1422_v28  ;;  %542 = vrot.lane.b32.xlu0 %v3342_v13, %s3071_s29  ;;  %2108 = vmatprep.mubr.f32.mxu0 %v3073_v20 }
 0x14e   : > { %1495 = vst [vmem:[#allocation3 + $0x1e0] sm:$0xf0] %v1479_v21  ;;  %716 = vrot.lane.b32.xlu1 %v3385_v18, %s3066_s6  ;;  %2179 = vmatprep.mubr.f32.mxu1 %v3073_v20 }
 0x14f   : > { %v3613_v29 = vpop.permute.xlu0 %1466 }
 0x150   : > { %v1171_v30 = vpop.permute.xlu1 %1170  ;;  %v1480_v33 = vsel %vm1476_vm9, %v1465_v25, %v3613_v29  ;;  %v1961_v35 = vld [vmem:[#allocation3 + $0xf8] sm:$0xff] }
 0x151   : > { %v1189_v34 = vsel %vm4437_vm12, %v1171_v30, %v1173_v5  ;;  %1496 = vst [vmem:[#allocation3 + $0x50] sm:$0xf0] %v1480_v33  ;;  %2060 = vmatprep.subr.mxu0 %v1961_v35  ;;  %718 = vrot.lane.b32.xlu0 %v3266_v1, %s3066_s6 }
 0x152   : > { %1205 = vst [vmem:[#allocation3 + $0x270] sm:$0xf] %v1189_v34  ;;  %774 = vrot.lane.b32.xlu1 %v3264_v0, %s4432_s3 }
 0x153   : > { %v1229_v13 = vpop.permute.xlu0 %1228 }
 0x154   : > { %v1058_v27 = vpop.permute.xlu1 %1057  ;;  %v1247_v38 = vsel %vm4436_vm13, %v1229_v13, %v1231_v9 }
 0x155   : > { %1263 = vst [vmem:[#allocation3 + $0x270] sm:$0xf0] %v1247_v38  ;;  %776 = vrot.lane.b32.xlu0 %v3406_v26, %s4432_s3  ;;  %v1978_v42 = vld [vmem:[#allocation3 + $0x1e0] sm:$0xff]  ;;  %v419_v26 = vcombine.low %v3373_v15, %v3373_v15  ;;  %s3072_s3 = smov 127  }
 0x156   : > { %480 = vrot.lane.b32.xlu1 %v3268_v2, %s3070_s28 }
 0x157   : > { %v3627_v39 = vpop.permute.xlu0 %1059 }
 0x158   : > { %v1116_v40 = vpop.permute.xlu1 %1115  ;;  %v1075_v1 = vsel %vm4439_vm14, %v1058_v27, %v3627_v39  ;;  %v1979_v41 = vld [vmem:[#allocation3 + $0x50] sm:$0xff] }
 0x159   : > { %1091 = vst [vmem:[#allocation3 + $0x228] sm:$0xf] %v1075_v1  ;;  %2127 = vmatprep.subr.mxu1 %v1979_v41  ;;  %538 = vrot.lane.b32.xlu0 %v3353_v14, %s3071_s29 }
 0x15a   : > { %425 = vrot.lane.b32.xlu1 %v3268_v2, %s3072_s3  ;;  %2128 = vmatpush1.msra.mxu1 %v1978_v42  ;;  %v3646_v2 = vld [vmem:[#allocation2 + $0x10] sm:$0xff] }
 0x15b   : > { %v3637_v43 = vpop.permute.xlu0 %1117  ;;  %v650_v55 = vcombine.low %v3646_v2, %v3646_v2 }
 0x15c   : > { %v1292_v45 = vpop.permute.xlu1 %1291  ;;  %v1133_v47 = vsel %vm4438_vm15, %v1116_v40, %v3637_v43  ;;  %v1960_v49 = vld [vmem:[#allocation3 + $0x270] sm:$0xff] }
 0x15d   : > { %v1306_v48 = vsel %vm4435_vm10, %v3543_v44, %v1292_v45  ;;  %1149 = vst [vmem:[#allocation3 + $0x228] sm:$0xf0] %v1133_v47  ;;  %2061 = vmatpush1.msra.mxu0 %v1960_v49  ;;  %427 = vrot.lane.b32.xlu0 %v419_v26, %s3072_s3 }
 0x15e   : > { %1322 = vst [vmem:[#allocation3 + $0xa8] sm:$0xf] %v1306_v48  ;;  %601 = vrot.lane.b32.xlu1 %v3385_v18, %s3068_s22  ;;  %v3741_v48 = vcombine.high %v3688_v17, %v3688_v17 }
 0x15f   : > { %v3648_v51 = vpop.permute.xlu0 %1293 }
 0x160   : > { %v1350_v52 = vpop.permute.xlu1 %1349  ;;  %v1307_v53 = vsel %vm4435_vm10, %v1292_v45, %v3648_v51  ;;  %vm4440_vm10 = vcmask 211968  }
 0x161   : > { %v1364_v44 = vsel %vm4434_vm11, %v3551_v50, %v1350_v52  ;;  %1323 = vst [vmem:[#allocation3 + $0xc8] sm:$0xf] %v1307_v53  ;;  %603 = vrot.lane.b32.xlu0 %v3646_v2, %s3068_s22  ;;  %v1850_v53 = vld [vmem:[#allocation2 + $0x24] sm:$0xf] }
 0x162   : > { %1380 = vst [vmem:[#allocation3 + $0xa8] sm:$0xf0] %v1364_v44  ;;  %659 = vrot.lane.b32.xlu1 %v3264_v0, %s3069_s15 }
 0x163   : > { %v3660_v57 = vpop.permute.xlu0 %1351 }
 0x164   : > { %v1056_v58 = vpop.permute.xlu1 %1055  ;;  %v1365_v54 = vsel %vm4434_vm11, %v1350_v52, %v3660_v57  ;;  %v1953_v50 = vld [vmem:[#allocation3 + $0x228] sm:$0xff]  ;;  %vm4441_vm11 = vcmask 220160  }
 0x165   : > { %v1074_v61 = vsel %vm4439_vm14, %v1056_v58, %v1058_v27  ;;  %1381 = vst [vmem:[#allocation3 + $0xc8] sm:$0xf0] %v1365_v54  ;;  %2062 = vmatprep.subr.mxu0 %v1953_v50  ;;  %661 = vrot.lane.b32.xlu0 %v650_v55, %s3069_s15 }
 0x166   : > { %1090 = vst [vmem:[#allocation3 + $0x2b8] sm:$0xf] %v1074_v61  ;;  %423 = vrot.lane.b32.xlu1 %v3353_v14, %s3072_s3 }
 0x167   : > { %v1114_v62 = vpop.permute.xlu0 %1113 }
 0x168   : > { %v1132_v63 = vsel %vm4438_vm15, %v1114_v62, %v1116_v40  ;;  %v943_v4 = vpop.permute.xlu1 %942 }
 0x169   : > { %1148 = vst [vmem:[#allocation3 + $0x2b8] sm:$0xf0] %v1132_v63  ;;  %486 = vrot.lane.b32.xlu0 %v3385_v18, %s3070_s28  ;;  %v1970_v18 = vld [vmem:[#allocation3 + $0xa8] sm:$0xff] }
 0x16a   : > { %488 = vrot.lane.b32.xlu1 %v3646_v2, %s3070_s28 }
 0x16b   : > { %v3675_v5 = vpop.permute.xlu0 %944 }
 0x16c   : > { %v960_v14 = vsel %vm4441_vm11, %v943_v4, %v3675_v5  ;;  %v1001_v6 = vpop.permute.xlu1 %1000  ;;  %v1971_v9 = vld [vmem:[#allocation3 + $0xc8] sm:$0xff] }
 0x16d   : > { %976 = vst [vmem:[#allocation3 + $0x2f0] sm:$0xf] %v960_v14  ;;  %2129 = vmatprep.subr.mxu1 %v1971_v9  ;;  %544 = vrot.lane.b32.xlu0 %v3264_v0, %s3071_s29  ;;  %v1735_v14 = vld [vmem:[#allocation2 + $0x24] sm:$0xf] }
 0x16e   : > { %546 = vrot.lane.b32.xlu1 %v650_v55, %s3071_s29  ;;  %2130 = vmatpush1.msra.mxu1 %v1970_v18 }
 0x16f   : > { %v3686_v16 = vpop.permute.xlu0 %1002 }
 0x170   : > { %v1018_v22 = vsel %vm4440_vm10, %v1001_v6, %v3686_v16  ;;  %v1177_v23 = vpop.permute.xlu1 %1176  ;;  %v1952_v24 = vld [vmem:[#allocation3 + $0x2b8] sm:$0xff] }
 0x171   : > { %1034 = vst [vmem:[#allocation3 + $0x2f0] sm:$0xf0] %v1018_v22  ;;  %v1191_v0 = vsel %vm4437_vm12, %v3585_v8, %v1177_v23  ;;  %2063 = vmatpush1.msra.mxu0 %v1952_v24  ;;  %1870 = vrot.lane.b32.xlu0 %v3681_v11, %s3047_s26 }
 0x172   : > { %1207 = vst [vmem:[#allocation3 + $0x1c8] sm:$0xf] %v1191_v0  ;;  %1872 = vrot.lane.b32.xlu1 %v3688_v17, %s3047_s26 }
 0x173   : > { %v3700_v25 = vpop.permute.xlu0 %1178 }
 0x174   : > { %v1192_v28 = vsel %vm4437_vm12, %v1177_v23, %v3700_v25  ;;  %v1235_v21 = vpop.permute.xlu1 %1234  ;;  %vm4442_vm12 = vcmask 228352  }
 0x175   : > { %1208 = vst [vmem:[#allocation3 + $0xb0] sm:$0xf] %v1192_v28  ;;  %v1249_v30 = vsel %vm4436_vm13, %v3593_v19, %v1235_v21  ;;  %429 = vrot.lane.b32.xlu0 %v3373_v15, %s3072_s3  ;;  %v3720_v15 = vcombine.low %v3688_v17, %v3688_v17 }
 0x176   : > { %1265 = vst [vmem:[#allocation3 + $0x1c8] sm:$0xf0] %v1249_v30  ;;  %431 = vrot.lane.b32.xlu1 %v650_v55, %s3072_s3 }
 0x177   : > { %v3709_v8 = vpop.permute.xlu0 %1236 }
 0x178   : > { %v1250_v31 = vsel %vm4436_vm13, %v1235_v21, %v3709_v8  ;;  %v941_v33 = vpop.permute.xlu1 %940  ;;  %v1945_v34 = vld [vmem:[#allocation3 + $0x2f0] sm:$0xff]  ;;  %vm4443_vm13 = vcmask 867328  }
 0x179   : > { %1266 = vst [vmem:[#allocation3 + $0xb0] sm:$0xf0] %v1250_v31  ;;  %v959_v35 = vsel %vm4441_vm11, %v941_v33, %v943_v4  ;;  %2064 = vmatprep.subr.mxu0 %v1945_v34  ;;  %1755 = vrot.lane.b32.xlu0 %v3681_v11, %s3048_s24 }
 0x17a   : > { %975 = vst [vmem:[#allocation3 + $0x1f8] sm:$0xf] %v959_v35  ;;  %1757 = vrot.lane.b32.xlu1 %v3688_v17, %s3048_s24 }
 0x17b   : > { %v999_v19 = vpop.permute.xlu0 %998 }
 0x17c   : > { %v1017_v37 = vsel %vm4440_vm10, %v999_v19, %v1001_v6  ;;  %v828_v13 = vpop.permute.xlu1 %827 }
 0x17d   : > { %1033 = vst [vmem:[#allocation3 + $0x1f8] sm:$0xf0] %v1017_v37  ;;  %1813 = vrot.lane.b32.xlu0 %v3296_v10, %s3049_s7  ;;  %v1962_v41 = vld [vmem:[#allocation3 + $0x1c8] sm:$0xff] }
 0x17e   : > { %1815 = vrot.lane.b32.xlu1 %v3720_v15, %s3049_s7 }
 0x17f   : > { %v3727_v27 = vpop.permute.xlu0 %829 }
 0x180   : > { %v845_v38 = vsel %vm4443_vm13, %v828_v13, %v3727_v27  ;;  %v886_v40 = vpop.permute.xlu1 %885  ;;  %v1963_v1 = vld [vmem:[#allocation3 + $0xb0] sm:$0xff] }
 0x181   : > { %861 = vst [vmem:[#allocation3 + $0x298] sm:$0xf] %v845_v38  ;;  %2131 = vmatprep.subr.mxu1 %v1963_v1  ;;  %1640 = vrot.lane.b32.xlu0 %v3681_v11, %s3050_s12  ;;  %v2836_v38 = vld [vmem:[#allocation2 + $0x14] sm:$0xff] }
 0x182   : > { %1642 = vrot.lane.b32.xlu1 %v3688_v17, %s3050_s12  ;;  %2132 = vmatpush1.msra.mxu1 %v1962_v41  ;;  %v2816_v41 = vld [vmem:[#allocation2 + $0x24] ss:$0 sps:$4 sm:$0xff]  }
 0x183   : > { %v3735_v42 = vpop.permute.xlu0 %887 }
 0x184   : > { %v903_v26 = vsel %vm4442_vm12, %v886_v40, %v3735_v42  ;;  %v1062_v45 = vpop.permute.xlu1 %1061  ;;  %v1944_v47 = vld [vmem:[#allocation3 + $0x1f8] sm:$0xff] }
 0x185   : > { %919 = vst [vmem:[#allocation3 + $0x298] sm:$0xf0] %v903_v26  ;;  %v1076_v49 = vsel %vm4439_vm14, %v3627_v39, %v1062_v45  ;;  %2065 = vmatpush1.msra.mxu0 %v1944_v47  ;;  %1698 = vrot.lane.b32.xlu0 %v3296_v10, %s3051_s13 }
 0x186   : > { %1092 = vst [vmem:[#allocation3 + $0x178] sm:$0xf] %v1076_v49  ;;  %1700 = vrot.lane.b32.xlu1 %v3720_v15, %s3051_s13  ;;  %v3814_v49 = vld [vmem:[#allocation2 + $0x10] sm:$0xff] }
 0x187   : > { %v3749_v52 = vpop.permute.xlu0 %1063 }
 0x188   : > { %v1077_v44 = vsel %vm4439_vm14, %v1062_v45, %v3749_v52  ;;  %v1120_v55 = vpop.permute.xlu1 %1119  ;;  %vm4444_vm14 = vcmask 875520  }
 0x189   : > { %1093 = vst [vmem:[#allocation3 + $0x200] sm:$0xf] %v1077_v44  ;;  %v1134_v58 = vsel %vm4438_vm15, %v3637_v43, %v1120_v55  ;;  %1874 = vrot.lane.b32.xlu0 %v3741_v48, %s3047_s26 }
 0x18a   : > { %1150 = vst [vmem:[#allocation3 + $0x178] sm:$0xf0] %v1134_v58  ;;  %1876 = vrot.lane.b32.xlu1 %v1850_v53, %s3047_s26  ;;  %v3818_v53 = vcombine.high %v3814_v49, %v3814_v49  ;;  %v3825_v58 = vld [vmem:[#allocation2 + $0x18] sm:$0xff]  ;;  %s4467_s26 = smov 17  }
 0x18b   : > { %v3758_v39 = vpop.permute.xlu0 %1121 }
 0x18c   : > { %v1135_v54 = vsel %vm4438_vm15, %v1120_v55, %v3758_v39  ;;  %v826_v61 = vpop.permute.xlu1 %825  ;;  %v1937_v50 = vld [vmem:[#allocation3 + $0x298] sm:$0xff]  ;;  %vm728_vm15 = vcmask 883712  }
 0x18d   : > { %1151 = vst [vmem:[#allocation3 + $0x200] sm:$0xf0] %v1135_v54  ;;  %v844_v62 = vsel %vm4443_vm13, %v826_v61, %v828_v13  ;;  %2066 = vmatprep.subr.mxu0 %v1937_v50  ;;  %1525 = vrot.lane.b32.xlu0 %v3681_v11, %s3052_s14 }
 0x18e   : > { %860 = vst [vmem:[#allocation3 + $0xd8] sm:$0xf] %v844_v62  ;;  %1527 = vrot.lane.b32.xlu1 %v3688_v17, %s3052_s14 }
 0x18f   : > { %v884_v43 = vpop.permute.xlu0 %883 }
 0x190   : > { %v902_v63 = vsel %vm4442_vm12, %v884_v43, %v886_v40  ;;  %v713_v4 = vpop.permute.xlu1 %712  ;;  %v3837_v43 = vcombine.low %v3825_v58, %v3825_v58 }
 0x191   : > { %918 = vst [vmem:[#allocation3 + $0xd8] sm:$0xf0] %v902_v63  ;;  %1583 = vrot.lane.b32.xlu0 %v3296_v10, %s3053_s25  ;;  %v1954_v22 = vld [vmem:[#allocation3 + $0x178] sm:$0xff] }
 0x192   : > { %1585 = vrot.lane.b32.xlu1 %v3720_v15, %s3053_s25  ;;  %v2815_v10 = vld [vmem:[#allocation2 + $0x24] ss:$0 sps:$4 sm:$0xff]  }
 0x193   : > { %v3772_v59 = vpop.permute.xlu0 %714 }
 0x194   : > { %v730_v6 = vsel %vm728_vm15, %v713_v4, %v3772_v59  ;;  %v771_v9 = vpop.permute.xlu1 %770  ;;  %v1955_v18 = vld [vmem:[#allocation3 + $0x200] sm:$0xff] }
 0x195   : > { %746 = vst [vmem:[#allocation3 + $0x120] sm:$0xf] %v730_v6  ;;  %2133 = vmatprep.subr.mxu1 %v1955_v18  ;;  %1759 = vrot.lane.b32.xlu0 %v3741_v48, %s3048_s24 }
 0x196   : > { %1761 = vrot.lane.b32.xlu1 %v1735_v14, %s3048_s24  ;;  %2134 = vmatpush1.msra.mxu1 %v1954_v22  ;;  %s4468_s24 = smov 27  }
 0x197   : > { %v3779_v23 = vpop.permute.xlu0 %772 }
 0x198   : > { %v788_v24 = vsel %vm4444_vm14, %v771_v9, %v3779_v23  ;;  %v947_v0 = vpop.permute.xlu1 %946  ;;  %v1936_v28 = vld [vmem:[#allocation3 + $0xd8] sm:$0xff] }
 0x199   : > { %804 = vst [vmem:[#allocation3 + $0x120] sm:$0xf0] %v788_v24  ;;  %v961_v21 = vsel %vm4441_vm11, %v3675_v5, %v947_v0  ;;  %2067 = vmatpush1.msra.mxu0 %v1936_v28  ;;  %1817 = vrot.lane.b32.xlu0 %v3688_v17, %s3049_s7 }
 0x19a   : > { %977 = vst [vmem:[#allocation3 + $0x358] sm:$0xf] %v961_v21  ;;  %1819 = vrot.lane.b32.xlu1 %v2815_v10, %s3049_s7  ;;  %s4469_s7 = smov 26  }
 0x19b   : > { %v3788_v30 = vpop.permute.xlu0 %948 }
 0x19c   : > { %v962_v31 = vsel %vm4441_vm11, %v947_v0, %v3788_v30  ;;  %v1005_v33 = vpop.permute.xlu1 %1004  ;;  %vm671_vm11 = vcmask 949248  }
 0x19d   : > { %978 = vst [vmem:[#allocation3 + $0x1c0] sm:$0xf] %v962_v31  ;;  %v1019_v34 = vsel %vm4440_vm10, %v3686_v16, %v1005_v33  ;;  %1410 = vrot.lane.b32.xlu0 %v3681_v11, %s3054_s11  ;;  %v1620_v16 = vld [vmem:[#allocation2 + $0x24] sm:$0xf] }
 0x19e   : > { %1035 = vst [vmem:[#allocation3 + $0x358] sm:$0xf0] %v1019_v34  ;;  %1412 = vrot.lane.b32.xlu1 %v3688_v17, %s3054_s11 }
 0x19f   : > { %v3798_v5 = vpop.permute.xlu0 %1006 }
 0x1a0   : > { %v1020_v35 = vsel %vm4440_vm10, %v1005_v33, %v3798_v5  ;;  %v711_v19 = vpop.permute.xlu1 %710  ;;  %v1929_v37 = vld [vmem:[#allocation3 + $0x120] sm:$0xff]  ;;  %vm613_vm10 = vcmask 957440  }
 0x1a1   : > { %1036 = vst [vmem:[#allocation3 + $0x1c0] sm:$0xf0] %v1020_v35  ;;  %v729_v13 = vsel %vm728_vm15, %v711_v19, %v713_v4  ;;  %2068 = vmatprep.subr.mxu0 %v1929_v37  ;;  %1468 = vrot.lane.b32.xlu0 %v2836_v38, %s3055_s30 }
 0x1a2   : > { %745 = vst [vmem:[#allocation3 + $0x350] sm:$0xf] %v729_v13  ;;  %1470 = vrot.lane.b32.xlu1 %v3720_v15, %s3055_s30 }
 0x1a3   : > { %v769_v11 = vpop.permute.xlu0 %768 }
 0x1a4   : > { %v787_v40 = vsel %vm4444_vm14, %v769_v11, %v771_v9  ;;  %v598_v1 = vpop.permute.xlu1 %597  ;;  %v1505_v9 = vld [vmem:[#allocation2 + $0x24] sm:$0xf] }
 0x1a5   : > { %803 = vst [vmem:[#allocation3 + $0x350] sm:$0xf0] %v787_v40  ;;  %1644 = vrot.lane.b32.xlu0 %v3741_v48, %s3050_s12  ;;  %v1946_v44 = vld [vmem:[#allocation3 + $0x358] sm:$0xff] }
 0x1a6   : > { %1646 = vrot.lane.b32.xlu1 %v1620_v16, %s3050_s12  ;;  %s4470_s12 = smov 106  }
 0x1a7   : > { %v3810_v26 = vpop.permute.xlu0 %599 }
 0x1a8   : > { %v615_v45 = vsel %vm613_vm10, %v598_v1, %v3810_v26  ;;  %v656_v47 = vpop.permute.xlu1 %655  ;;  %v1947_v15 = vld [vmem:[#allocation3 + $0x1c0] sm:$0xff] }
 0x1a9   : > { %631 = vst [vmem:[#allocation3 + $0x330] sm:$0xf] %v615_v45  ;;  %2135 = vmatprep.subr.mxu1 %v1947_v15  ;;  %1702 = vrot.lane.b32.xlu0 %v3688_v17, %s3051_s13 }
 0x1aa   : > { %1704 = vrot.lane.b32.xlu1 %v2816_v41, %s3051_s13  ;;  %2136 = vmatpush1.msra.mxu1 %v1946_v44  ;;  %s4471_s13 = smov 28  }
 0x1ab   : > { %v3823_v55 = vpop.permute.xlu0 %657 }
 0x1ac   : > { %v673_v54 = vsel %vm671_vm11, %v656_v47, %v3823_v55  ;;  %v832_v61 = vpop.permute.xlu1 %831  ;;  %v1928_v50 = vld [vmem:[#allocation3 + $0x350] sm:$0xff] }
 0x1ad   : > { %689 = vst [vmem:[#allocation3 + $0x330] sm:$0xf0] %v673_v54  ;;  %v846_v62 = vsel %vm4443_vm13, %v3727_v27, %v832_v61  ;;  %2069 = vmatpush1.msra.mxu0 %v1928_v50  ;;  %1295 = vrot.lane.b32.xlu0 %v3818_v53, %s3056_s8 }
 0x1ae   : > { %862 = vst [vmem:[#allocation3 + $0xb8] sm:$0xf] %v846_v62  ;;  %1297 = vrot.lane.b32.xlu1 %v3825_v58, %s3056_s8 }
 0x1af   : > { %v3839_v63 = vpop.permute.xlu0 %833 }
 0x1b0   : > { %v847_v4 = vsel %vm4443_vm13, %v832_v61, %v3839_v63  ;;  %v890_v14 = vpop.permute.xlu1 %889  ;;  %vm556_vm13 = vcmask 965632  }
 0x1b1   : > { %863 = vst [vmem:[#allocation3 + $0x170] sm:$0xf] %v847_v4  ;;  %v904_v27 = vsel %vm4442_vm12, %v3735_v42, %v890_v14  ;;  %1353 = vrot.lane.b32.xlu0 %v3814_v49, %s3057_s16  ;;  %v2819_v42 = vld [vmem:[#allocation2 + $0x24] ss:$0 sps:$4 sm:$0xff]  }
 0x1b2   : > { %920 = vst [vmem:[#allocation3 + $0xb8] sm:$0xf0] %v904_v27  ;;  %1355 = vrot.lane.b32.xlu1 %v3837_v43, %s3057_s16 }
 0x1b3   : > { %v3849_v6 = vpop.permute.xlu0 %891 }
 0x1b4   : > { %v905_v18 = vsel %vm4442_vm12, %v890_v14, %v3849_v6  ;;  %v596_v22 = vpop.permute.xlu1 %595  ;;  %v1921_v10 = vld [vmem:[#allocation3 + $0x330] sm:$0xff]  ;;  %vm498_vm12 = vcmask 1031168  }
 0x1b5   : > { %921 = vst [vmem:[#allocation3 + $0x170] sm:$0xf0] %v905_v18  ;;  %v614_v24 = vsel %vm613_vm10, %v596_v22, %v598_v1  ;;  %2070 = vmatprep.subr.mxu0 %v1921_v10  ;;  %1529 = vrot.lane.b32.xlu0 %v3741_v48, %s3052_s14  ;;  %v1390_v1 = vld [vmem:[#allocation2 + $0x24] sm:$0xf] }
 0x1b6   : > { %630 = vst [vmem:[#allocation3 + $0x28] sm:$0xf] %v614_v24  ;;  %1531 = vrot.lane.b32.xlu1 %v1505_v9, %s3052_s14  ;;  %v3907_v9 = vcombine.high %v3825_v58, %v3825_v58  ;;  %v1275_v24 = vld [vmem:[#allocation2 + $0x20] sm:$0xf]  ;;  %s4472_s14 = smov 107  }
 0x1b7   : > { %v654_v0 = vpop.permute.xlu0 %653 }
 0x1b8   : > { %v672_v28 = vsel %vm671_vm11, %v654_v0, %v656_v47  ;;  %v483_v21 = vpop.permute.xlu1 %482 }
 0x1b9   : > { %688 = vst [vmem:[#allocation3 + $0x28] sm:$0xf0] %v672_v28  ;;  %1587 = vrot.lane.b32.xlu0 %v3688_v17, %s3053_s25  ;;  %v1938_v19 = vld [vmem:[#allocation3 + $0xb8] sm:$0xff] }
 0x1ba   : > { %1589 = vrot.lane.b32.xlu1 %v2819_v42, %s3053_s25  ;;  %s2662_s25 = sshll.u32 %s3240_s0, 6 }
 0x1bb   : > { %v3861_v31 = vpop.permute.xlu0 %484 }
 0x1bc   : > { %v500_v33 = vsel %vm498_vm12, %v483_v21, %v3861_v31  ;;  %v541_v34 = vpop.permute.xlu1 %540  ;;  %v1939_v35 = vld [vmem:[#allocation3 + $0x170] sm:$0xff] }
 0x1bd   : > { %516 = vst [vmem:[#allocation3 + $0x110] sm:$0xf] %v500_v33  ;;  %2137 = vmatprep.subr.mxu1 %v1939_v35  ;;  %1180 = vrot.lane.b32.xlu0 %v3818_v53, %s3058_s9 }
 0x1be   : > { %1182 = vrot.lane.b32.xlu1 %v3825_v58, %s3058_s9  ;;  %2138 = vmatpush1.msra.mxu1 %v1938_v19 }
 0x1bf   : > { %v3869_v37 = vpop.permute.xlu0 %542 }
 0x1c0   : > { %v558_v13 = vsel %vm556_vm13, %v541_v34, %v3869_v37  ;;  %v717_v38 = vpop.permute.xlu1 %716  ;;  %v1920_v11 = vld [vmem:[#allocation3 + $0x28] sm:$0xff] }
 0x1c1   : > { %574 = vst [vmem:[#allocation3 + $0x110] sm:$0xf0] %v558_v13  ;;  %v731_v16 = vsel %vm728_vm15, %v3772_v59, %v717_v38  ;;  %2071 = vmatpush1.msra.mxu0 %v1920_v11  ;;  %1238 = vrot.lane.b32.xlu0 %v3814_v49, %s3059_s10  ;;  %v2820_v59 = vld [vmem:[#allocation2 + $0x24] ss:$0 sps:$4 sm:$0xff]  }
 0x1c2   : > { %747 = vst [vmem:[#allocation3 + $0x1a0] sm:$0xf] %v731_v16  ;;  %1240 = vrot.lane.b32.xlu1 %v3837_v43, %s3059_s10 }
 0x1c3   : > { %v3879_v40 = vpop.permute.xlu0 %718 }
 0x1c4   : > { %v732_v41 = vsel %vm728_vm15, %v717_v38, %v3879_v40  ;;  %v775_v45 = vpop.permute.xlu1 %774 }
 0x1c5   : > { %748 = vst [vmem:[#allocation3 + $0x260] sm:$0xf] %v732_v41  ;;  %v789_v47 = vsel %vm4444_vm14, %v3779_v23, %v775_v45  ;;  %1414 = vrot.lane.b32.xlu0 %v3741_v48, %s3054_s11 }
 0x1c6   : > { %805 = vst [vmem:[#allocation3 + $0x1a0] sm:$0xf0] %v789_v47  ;;  %1416 = vrot.lane.b32.xlu1 %v1390_v1, %s3054_s11  ;;  %v3946_v47 = vld [vmem:[#allocation9] sm:$0xff]  ;;  %s4270_s11 = scalar_lea.vmem [#allocation12], %s2662_s25 }
 0x1c7   : > { %v3888_v15 = vpop.permute.xlu0 %776 }
 0x1c8   : > { %v790_v44 = vsel %vm4444_vm14, %v775_v45, %v3888_v15  ;;  %v481_v54 = vpop.permute.xlu1 %480  ;;  %v1913_v61 = vld [vmem:[#allocation3 + $0x110] sm:$0xff]  ;;  %vm441_vm14 = vcmask 1039360  }
 0x1c9   : > { %806 = vst [vmem:[#allocation3 + $0x260] sm:$0xf0] %v790_v44  ;;  %v499_v50 = vsel %vm498_vm12, %v481_v54, %v483_v21  ;;  %1472 = vrot.lane.b32.xlu0 %v3688_v17, %s3055_s30  ;;  %2072 = vmatprep.subr.mxu0 %v1913_v61  ;;  %v2821_v21 = vld [vmem:[#allocation2 + $0x20] ss:$0 sps:$4 sm:$0xff]  }
 0x1ca   : > { %515 = vst [vmem:[#allocation3 + $0x108] sm:$0xf] %v499_v50  ;;  %1474 = vrot.lane.b32.xlu1 %v2820_v59, %s3055_s30  ;;  %v1160_v61 = vld [vmem:[#allocation2 + $0x20] sm:$0xf]  ;;  %s368_s30 = scalar_select %p367_p6, %s3033_s21, 1 }
 0x1cb   : > { %v539_v48 = vpop.permute.xlu0 %538 }
 0x1cc   : > { %v557_v23 = vsel %vm556_vm13, %v539_v48, %v541_v34  ;;  %v426_v62 = vpop.permute.xlu1 %425 }
 0x1cd   : > { %573 = vst [vmem:[#allocation3 + $0x108] sm:$0xf0] %v557_v23  ;;  %1065 = vrot.lane.b32.xlu0 %v3818_v53, %s3060_s2  ;;  %v1930_v22 = vld [vmem:[#allocation3 + $0x1a0] sm:$0xff] }
 0x1ce   : > { %1067 = vrot.lane.b32.xlu1 %v3825_v58, %s3060_s2 }
 0x1cf   : > { %v3901_v4 = vpop.permute.xlu0 %427 }
 0x1d0   : > { %v443_v17 = vsel %vm441_vm14, %v426_v62, %v3901_v4  ;;  %v602_v14 = vpop.permute.xlu1 %601  ;;  %v1931_v27 = vld [vmem:[#allocation3 + $0x260] sm:$0xff] }
 0x1d1   : > { %459 = vst [vmem:[#allocation3 + $0xd0] sm:$0xf0] %v443_v17  ;;  %v616_v18 = vsel %vm613_vm10, %v3810_v26, %v602_v14  ;;  %1123 = vrot.lane.b32.xlu0 %v3814_v49, %s4467_s26  ;;  %2139 = vmatprep.subr.mxu1 %v1931_v27 }
 0x1d2   : > { %632 = vst [vmem:[#allocation3 + $0x2d0] sm:$0xf] %v616_v18  ;;  %1125 = vrot.lane.b32.xlu1 %v3837_v43, %s4467_s26  ;;  %2140 = vmatpush1.msra.mxu1 %v1930_v22 }
 0x1d3   : > { %v3915_v10 = vpop.permute.xlu0 %603 }
 0x1d4   : > { %v617_v42 = vsel %vm613_vm10, %v602_v14, %v3915_v10  ;;  %v660_v0 = vpop.permute.xlu1 %659  ;;  %v1912_v28 = vld [vmem:[#allocation3 + $0x108] sm:$0xff] }
 0x1d5   : > { %633 = vst [vmem:[#allocation3 + $0x198] sm:$0xf] %v617_v42  ;;  %v674_v26 = vsel %vm671_vm11, %v3823_v55, %v660_v0  ;;  %1299 = vrot.lane.b32.xlu0 %v3907_v9, %s3056_s8  ;;  %2073 = vmatpush1.msra.mxu0 %v1912_v28 }
 0x1d6   : > { %690 = vst [vmem:[#allocation3 + $0x2d0] sm:$0xf0] %v674_v26  ;;  %1301 = vrot.lane.b32.xlu1 %v1275_v24, %s3056_s8  ;;  %s2663_s8 = sshll.u32 %s368_s30, 3 }
 0x1d7   : > { %v3924_v33 = vpop.permute.xlu0 %661 }
 0x1d8   : > { %v675_v34 = vsel %vm671_vm11, %v660_v0, %v3924_v33  ;;  %v424_v35 = vpop.permute.xlu1 %423  ;;  %v1905_v19 = vld [vmem:[#allocation3 + $0xd0] sm:$0xff] }
 0x1d9   : > { %691 = vst [vmem:[#allocation3 + $0x198] sm:$0xf0] %v675_v34  ;;  %v442_v13 = vsel %vm441_vm14, %v424_v35, %v426_v62  ;;  %1357 = vrot.lane.b32.xlu0 %v3825_v58, %s3057_s16  ;;  %2074 = vmatprep.subr.mxu0 %v1905_v19  ;;  %v2823_v62 = vld [vmem:[#allocation2 + $0x20] ss:$0 sps:$4 sm:$0xff]  }
 0x1da   : > { %458 = vst [vmem:[#allocation3 + $0x2b0] sm:$0xf0] %v442_v13  ;;  %1359 = vrot.lane.b32.xlu1 %v2821_v21, %s3057_s16 }
 0x1db   : > { %v487_v55 = vpop.permute.xlu0 %486 }
 0x1dc   : > { %v501_v38 = vsel %vm498_vm12, %v3861_v31, %v487_v55  ;;  %v3934_v11 = vpop.permute.xlu1 %488 }
 0x1dd   : > { %517 = vst [vmem:[#allocation3 + $0x90] sm:$0xf] %v501_v38  ;;  %v502_v16 = vsel %vm498_vm12, %v487_v55, %v3934_v11  ;;  %950 = vrot.lane.b32.xlu0 %v3818_v53, %s4468_s24  ;;  %v1045_v38 = vld [vmem:[#allocation2 + $0x20] sm:$0xf] }
 0x1de   : > { %518 = vst [vmem:[#allocation3 + $0x318] sm:$0xf] %v502_v16  ;;  %952 = vrot.lane.b32.xlu1 %v3825_v58, %s4468_s24 }
 0x1df   : > { %v545_v1 = vpop.permute.xlu0 %544 }
 0x1e0   : > { %v559_v41 = vsel %vm556_vm13, %v3869_v37, %v545_v1  ;;  %v3944_v45 = vpop.permute.xlu1 %546  ;;  %v1923_v31 = vld [vmem:[#allocation3 + $0x198] sm:$0xff]  ;;  %v1922_v37 = vld [vmem:[#allocation3 + $0x2d0] sm:$0xff] }
 0x1e1   : > { %575 = vst [vmem:[#allocation3 + $0x90] sm:$0xf0] %v559_v41  ;;  %v560_v59 = vsel %vm556_vm13, %v545_v1, %v3944_v45  ;;  %1008 = vrot.lane.b32.xlu0 %v3814_v49, %s4469_s7  ;;  %2141 = vmatprep.subr.mxu1 %v1923_v31  ;;  %v1904_v44 = vld [vmem:[#allocation3 + $0x2b0] sm:$0xff]  ;;  %v2825_v41 = vld [vmem:[#allocation2 + $0x20] ss:$0 sps:$4 sm:$0xff]  }
 0x1e2   : > { %576 = vst [vmem:[#allocation3 + $0x318] sm:$0xf0] %v560_v59  ;;  %1010 = vrot.lane.b32.xlu1 %v3837_v43, %s4469_s7  ;;  %2075 = vmatpush1.msra.mxu0 %v1904_v44 }
 0x1e3   : > { %2142 = vmatpush1.msra.mxu1 %v1922_v37  ;;  %v1871_v54 = vpop.permute.xlu0 %1870  ;;  %2666 = vmatmul.mubr.msk.f32.vlgmr.msra.gmra.mxu0 %vm728_vm15, %v3946_v47 }
 0x1e4   : > { %v1883_v50 = vsel %vm1878_vm0, %v3443_v46, %v1871_v54  ;;  %v3958_v48 = vpop.permute.xlu1 %1872  ;;  %2250 = vmatprep.mubr.f32.mxu0 %v3073_v20 }
 0x1e5   : > { %1899 = vst [vmem:[#allocation3] sm:$0xf] %v1883_v50  ;;  %v1884_v23 = vsel %vm1878_vm0, %v1871_v54, %v3958_v48  ;;  %1184 = vrot.lane.b32.xlu0 %v3907_v9, %s3058_s9 }
 0x1e6   : > { %1900 = vst [vmem:[#allocation3 + $0x2a0] sm:$0xf] %v1884_v23  ;;  %1186 = vrot.lane.b32.xlu1 %v1160_v61, %s3058_s9 }
 0x1e7   : > { %v430_v17 = vpop.permute.xlu0 %429 }
 0x1e8   : > { %v444_v14 = vsel %vm441_vm14, %v3901_v4, %v430_v17  ;;  %v3968_v46 = vpop.permute.xlu1 %431  ;;  %v1914_v27 = vld [vmem:[#allocation3 + $0x90] sm:$0xff] }
 0x1e9   : > { %460 = vst [vmem:[#allocation3 + $0x10] sm:$0xf0] %v444_v14  ;;  %v445_v18 = vsel %vm441_vm14, %v430_v17, %v3968_v46  ;;  %1242 = vrot.lane.b32.xlu0 %v3825_v58, %s3059_s10  ;;  %v1915_v22 = vld [vmem:[#allocation3 + $0x318] sm:$0xff] }
 0x1ea   : > { %461 = vst [vmem:[#allocation3 + $0x48] sm:$0xf0] %v445_v18  ;;  %1244 = vrot.lane.b32.xlu1 %v2823_v62, %s3059_s10  ;;  %2143 = vmatprep.subr.mxu1 %v1915_v22  ;;  %v930_v18 = vld [vmem:[#allocation2 + $0x20] sm:$0xf]  ;;  %s4354_s10 = scalar_lea.vmem %s4416_s5, %s2663_s8 }
 0x1eb   : > { %2144 = vmatpush1.msra.mxu1 %v1914_v27  ;;  %v1756_v24 = vpop.permute.xlu0 %1755 }
 0x1ec   : > { %v1768_v4 = vsel %vm1763_vm2, %v3477_v3, %v1756_v24  ;;  %v3977_v42 = vpop.permute.xlu1 %1757  ;;  %v2012_v0 = vld [vmem:[#allocation3] sm:$0xf] }
 0x1ed   : > { %1784 = vst [vmem:[#allocation3 + $0x88] sm:$0xf] %v1768_v4  ;;  %v1769_v28 = vsel %vm1763_vm2, %v1756_v24, %v3977_v42  ;;  %835 = vrot.lane.b32.xlu0 %v3818_v53, %s4470_s12  ;;  %v2013_v26 = vld [vmem:[#allocation3 + $0x2a0] sm:$0xf] }
 0x1ee   : > { %1785 = vst [vmem:[#allocation3 + $0x368] sm:$0xf] %v1769_v28  ;;  %837 = vrot.lane.b32.xlu1 %v3825_v58, %s4470_s12  ;;  %2670 = vmatprep.subr.msk.mxu0 %vm2019_vm3, %v2013_v26 }
 0x1ef   : > { %2671 = vmatpush1.msk.msra.mxu0 %vm2019_vm3, %v2012_v0  ;;  %v1814_v3 = vpop.permute.xlu0 %1813  ;;  %v2826_v0 = vld [vmem:[#allocation2 + $0x20] ss:$0 sps:$4 sm:$0xff]  }
 0x1f0   : > { %v1826_v21 = vsel %vm1821_vm1, %v3487_v7, %v1814_v3  ;;  %v3989_v34 = vpop.permute.xlu1 %1815  ;;  %v1906_v35 = vld [vmem:[#allocation3 + $0x10] sm:$0xff] }
 0x1f1   : > { %1842 = vst [vmem:[#allocation3 + $0x88] sm:$0xf0] %v1826_v21  ;;  %v1827_v19 = vsel %vm1821_vm1, %v1814_v3, %v3989_v34  ;;  %893 = vrot.lane.b32.xlu0 %v3814_v49, %s4471_s13  ;;  %v1907_v13 = vld [vmem:[#allocation3 + $0x48] sm:$0xff]  ;;  %v593_v3 = vcombine.high %v3646_v2, %v3646_v2 }
 0x1f2   : > { %1843 = vst [vmem:[#allocation3 + $0x368] sm:$0xf0] %v1827_v19  ;;  %895 = vrot.lane.b32.xlu1 %v3837_v43, %s4471_s13  ;;  %2145 = vmatprep.subr.mxu1 %v1907_v13 }
 0x1f3   : > { %2146 = vmatpush1.msra.mxu1 %v1906_v35  ;;  %v1641_v55 = vpop.permute.xlu0 %1640 }
 0x1f4   : > { %v1653_v7 = vsel %vm1648_vm4, %v3519_v32, %v1641_v55  ;;  %v3999_v16 = vpop.permute.xlu1 %1642  ;;  %2669 = vmatmul.mubr.msk.f32.vlgmr.msra.gmra.mxu1 %vm728_vm15, %v3946_v47 }
 0x1f5   : > { %1669 = vst [vmem:[#allocation3 + $0x280] sm:$0xf] %v1653_v7  ;;  %v1654_v1 = vsel %vm1648_vm4, %v1641_v55, %v3999_v16  ;;  %1069 = vrot.lane.b32.xlu0 %v3907_v9, %s3060_s2  ;;  %2321 = vmatprep.mubr.f32.mxu1 %v3073_v20 }
 0x1f6   : > { %1670 = vst [vmem:[#allocation3 + $0x300] sm:$0xf] %v1654_v1  ;;  %1071 = vrot.lane.b32.xlu1 %v1045_v38, %s3060_s2  ;;  %s2681_s2 = sshll.u32 %s3033_s21, 10 }
 0x1f7   : > { %v1699_v31 = vpop.permute.xlu0 %1698 }
 0x1f8   : > { %v1711_v32 = vsel %vm1706_vm5, %v3529_v36, %v1699_v31  ;;  %v4011_v59 = vpop.permute.xlu1 %1700  ;;  %v2004_v44 = vld [vmem:[#allocation3 + $0x88] sm:$0xff] }
 0x1f9   : > { %1727 = vst [vmem:[#allocation3 + $0x280] sm:$0xf0] %v1711_v32  ;;  %v1712_v37 = vsel %vm1706_vm5, %v1699_v31, %v4011_v59  ;;  %1127 = vrot.lane.b32.xlu0 %v3825_v58, %s4467_s26  ;;  %v2005_v54 = vld [vmem:[#allocation3 + $0x368] sm:$0xff]  ;;  %v815_v32 = vld [vmem:[#allocation2 + $0x20] sm:$0xf] }
 0x1fa   : > { %1728 = vst [vmem:[#allocation3 + $0x300] sm:$0xf0] %v1712_v37  ;;  %1129 = vrot.lane.b32.xlu1 %v2825_v41, %s4467_s26  ;;  %2192 = vmatprep.subr.mxu0 %v2005_v54  ;;  %s3074_s26 = smov [#allocation12]  }
 0x1fb   : > { %2193 = vmatpush1.msra.mxu0 %v2004_v44  ;;  %v1875_v20 = vpop.permute.xlu0 %1874 }
 0x1fc   : > { %v1885_v36 = vsel %vm1878_vm0, %v3958_v48, %v1875_v20  ;;  %v1877_v61 = vpop.permute.xlu1 %1876 }
 0x1fd   : > { %1901 = vst [vmem:[#allocation3 + $0x1b0] sm:$0xf] %v1885_v36  ;;  %v1886_v50 = vsel %vm1878_vm0, %v1875_v20, %v1877_v61  ;;  %720 = vrot.lane.b32.xlu0 %v3818_v53, %s3066_s6  ;;  %v2827_v20 = vld [vmem:[#allocation2 + $0x20] ss:$0 sps:$4 sm:$0xff]   ;;  %vm4473_vm0 = vcmask 56320  }
 0x1fe   : > { %1902 = vst [vmem:[#allocation3 + $0x150] sm:$0xf] %v1886_v50  ;;  %722 = vrot.lane.b32.xlu1 %v3825_v58, %s3066_s6 }
 0x1ff   : > { %v1526_v23 = vpop.permute.xlu0 %1525 }
 0x200   : > { %v1538_v62 = vsel %vm1533_vm6, %v3561_v56, %v1526_v23  ;;  %v4027_v17 = vpop.permute.xlu1 %1527  ;;  %v1996_v14 = vld [vmem:[#allocation3 + $0x280] sm:$0xff] }
 0x201   : > { %1554 = vst [vmem:[#allocation3 + $0x188] sm:$0xf] %v1538_v62  ;;  %v1539_v48 = vsel %vm1533_vm6, %v1526_v23, %v4027_v17  ;;  %778 = vrot.lane.b32.xlu0 %v3814_v49, %s4472_s14  ;;  %v1997_v27 = vld [vmem:[#allocation3 + $0x300] sm:$0xff] }
 0x202   : > { %1555 = vst [vmem:[#allocation3 + $0x238] sm:$0xf] %v1539_v48  ;;  %780 = vrot.lane.b32.xlu1 %v3837_v43, %s4472_s14  ;;  %2194 = vmatprep.subr.mxu0 %v1997_v27 }
 0x203   : > { %2195 = vmatpush1.msra.mxu0 %v1996_v14  ;;  %v1584_v53 = vpop.permute.xlu0 %1583 }
 0x204   : > { %v1596_v56 = vsel %vm1591_vm7, %v3571_v60, %v1584_v53  ;;  %v4037_v22 = vpop.permute.xlu1 %1585  ;;  %v2014_v24 = vld [vmem:[#allocation3 + $0x1b0] sm:$0xf] }
 0x205   : > { %1612 = vst [vmem:[#allocation3 + $0x188] sm:$0xf0] %v1596_v56  ;;  %v1597_v4 = vsel %vm1591_vm7, %v1584_v53, %v4037_v22  ;;  %954 = vrot.lane.b32.xlu0 %v3907_v9, %s4468_s24  ;;  %v2015_v49 = vld [vmem:[#allocation3 + $0x150] sm:$0xf] }
 0x206   : > { %1613 = vst [vmem:[#allocation3 + $0x238] sm:$0xf0] %v1597_v4  ;;  %956 = vrot.lane.b32.xlu1 %v930_v18, %s4468_s24  ;;  %2673 = vmatprep.subr.msk.mxu1 %vm2019_vm3, %v2015_v49  ;;  %v386_v18 = vld [vmem:[#allocation2 + $0x10] sm:$0xff]  ;;  %s2953_s24 = sshll.u32 %s3074_s26, 4  ;;  %s2954_s24 = int_to_ptr.vmem [resolvable:$false] %s2953_s24 }
 0x207   : > { %2674 = vmatpush1.msk.msra.mxu1 %vm2019_vm3, %v2014_v24  ;;  %v1760_v60 = vpop.permute.xlu0 %1759  ;;  %v394_v24 = vcombine.high %v386_v18, %v386_v18  ;;  %404 = vst [vmem:[#allocation3 + $0x360] sm:$0xf] %v386_v18  ;;  %v2838_v49 = vld [vmem:[#allocation2 + $0x10] sm:$0xff] }
 0x208   : > { %v1770_v28 = vsel %vm1763_vm2, %v3977_v42, %v1760_v60  ;;  %v1762_v26 = vpop.permute.xlu1 %1761 }
 0x209   : > { %1786 = vst [vmem:[#allocation3 + $0x180] sm:$0xf] %v1770_v28  ;;  %v1771_v21 = vsel %vm1763_vm2, %v1760_v60, %v1762_v26  ;;  %1012 = vrot.lane.b32.xlu0 %v3825_v58, %s4469_s7  ;;  %405 = vst [vmem:[#allocation3 + $0x328] sm:$0xf] %v394_v24  ;;  %v700_v60 = vld [vmem:[#allocation2 + $0x20] sm:$0xf] }
 0x20a   : > { %1787 = vst [vmem:[#allocation3 + $0x250] sm:$0xf] %v1771_v21  ;;  %1014 = vrot.lane.b32.xlu1 %v2826_v0, %s4469_s7  ;;  %vm4475_vm2 = vcmask 48128   ;;  %s2955_s7 = scalar_lea.vmem %s2954_s24, 2048 }
 0x20b   : > { %v1818_v35 = vpop.permute.xlu0 %1817  ;;  %vm4476_vm3 = vmmov %vm4475_vm2 }
 0x20c   : > { %v1828_v19 = vsel %vm1821_vm1, %v3989_v34, %v1818_v35  ;;  %v1820_v13 = vpop.permute.xlu1 %1819  ;;  %v1988_v55 = vld [vmem:[#allocation3 + $0x188] sm:$0xff] }
 0x20d   : > { %1844 = vst [vmem:[#allocation3 + $0x180] sm:$0xf0] %v1828_v19  ;;  %v1829_v42 = vsel %vm1821_vm1, %v1818_v35, %v1820_v13  ;;  %605 = vrot.lane.b32.xlu0 %v593_v3, %s3068_s22  ;;  %v1989_v38 = vld [vmem:[#allocation3 + $0x238] sm:$0xff]  ;;  %vm4474_vm1 = vmmov %vm4473_vm0 }
 0x20e   : > { %1845 = vst [vmem:[#allocation3 + $0x250] sm:$0xf0] %v1829_v42  ;;  %607 = vrot.lane.b32.xlu1 %v3825_v58, %s3068_s22  ;;  %2196 = vmatprep.subr.mxu0 %v1989_v38  ;;  %v2828_v35 = vld [vmem:[#allocation2 + $0x20] ss:$0 sps:$4 sm:$0xff]  }
 0x20f   : > { %2197 = vmatpush1.msra.mxu0 %v1988_v55  ;;  %v1411_v7 = vpop.permute.xlu0 %1410 }
 0x210   : > { %v1423_v1 = vsel %vm1418_vm8, %v3603_v12, %v1411_v7  ;;  %v4062_v41 = vpop.permute.xlu1 %1412 }
 0x211   : > { %1439 = vst [vmem:[#allocation3 + $0x80] sm:$0xf] %v1423_v1  ;;  %v1424_v34 = vsel %vm1418_vm8, %v1411_v7, %v4062_v41  ;;  %663 = vrot.lane.b32.xlu0 %v3646_v2, %s3069_s15 }
 0x212   : > { %1440 = vst [vmem:[#allocation3 + $0x1f0] sm:$0xf] %v1424_v34  ;;  %665 = vrot.lane.b32.xlu1 %v3837_v43, %s3069_s15 }
 0x213   : > { %v1469_v31 = vpop.permute.xlu0 %1468 }
 0x214   : > { %v1481_v44 = vsel %vm1476_vm9, %v3613_v29, %v1469_v31  ;;  %v4072_v37 = vpop.permute.xlu1 %1470  ;;  %v2006_v12 = vld [vmem:[#allocation3 + $0x180] sm:$0xff] }
 0x215   : > { %1497 = vst [vmem:[#allocation3 + $0x80] sm:$0xf0] %v1481_v44  ;;  %v1482_v54 = vsel %vm1476_vm9, %v1469_v31, %v4072_v37  ;;  %839 = vrot.lane.b32.xlu0 %v3907_v9, %s4470_s12  ;;  %v2007_v2 = vld [vmem:[#allocation3 + $0x250] sm:$0xff] }
 0x216   : > { %1498 = vst [vmem:[#allocation3 + $0x1f0] sm:$0xf0] %v1482_v54  ;;  %841 = vrot.lane.b32.xlu1 %v815_v32, %s4470_s12  ;;  %2263 = vmatprep.subr.mxu1 %v2007_v2  ;;  %v585_v32 = vld [vmem:[#allocation2 + $0x20] sm:$0xf]  ;;  %v387_v2 = vld [vmem:[#allocation2 + $0x18] sm:$0xff] }
 0x217   : > { %2264 = vmatpush1.msra.mxu1 %v2006_v12  ;;  %v1645_v36 = vpop.permute.xlu0 %1644  ;;  %406 = vst [vmem:[#allocation3 + $0x40] sm:$0xf] %v387_v2 }
 0x218   : > { %v1655_v29 = vsel %vm1648_vm4, %v3999_v16, %v1645_v36  ;;  %v1647_v61 = vpop.permute.xlu1 %1646 }
 0x219   : > { %1671 = vst [vmem:[#allocation3 + $0x308] sm:$0xf] %v1655_v29  ;;  %v1656_v50 = vsel %vm1648_vm4, %v1645_v36, %v1647_v61  ;;  %897 = vrot.lane.b32.xlu0 %v3825_v58, %s4471_s13  ;;  %vm4477_vm4 = vcmask 130048   ;;  %v395_v29 = vcombine.high %v387_v2, %v387_v2 }
 0x21a   : > { %1672 = vst [vmem:[#allocation3 + $0x290] sm:$0xf] %v1656_v50  ;;  %899 = vrot.lane.b32.xlu1 %v2827_v20, %s4471_s13 }
 0x21b   : > { %v1703_v23 = vpop.permute.xlu0 %1702  ;;  %407 = vst [vmem:[#allocation3 + $0x378] sm:$0xf] %v395_v29 }
 0x21c   : > { %v1713_v62 = vsel %vm1706_vm5, %v4011_v59, %v1703_v23  ;;  %v1705_v14 = vpop.permute.xlu1 %1704  ;;  %v1980_v48 = vld [vmem:[#allocation3 + $0x80] sm:$0xff] }
 0x21d   : > { %1729 = vst [vmem:[#allocation3 + $0x308] sm:$0xf0] %v1713_v62  ;;  %v1714_v27 = vsel %vm1706_vm5, %v1703_v23, %v1705_v14  ;;  %490 = vrot.lane.b32.xlu0 %v593_v3, %s3070_s28  ;;  %v1981_v16 = vld [vmem:[#allocation3 + $0x1f0] sm:$0xff]  ;;  %vm4478_vm5 = vmmov %vm4477_vm4  ;;  %v470_v23 = vld [vmem:[#allocation2 + $0x20] sm:$0xf] }
 0x21e   : > { %1730 = vst [vmem:[#allocation3 + $0x290] sm:$0xf0] %v1714_v27  ;;  %492 = vrot.lane.b32.xlu1 %v3825_v58, %s3070_s28  ;;  %2198 = vmatprep.subr.mxu0 %v1981_v16  ;;  %v2830_v27 = vld [vmem:[#allocation2 + $0x20] ss:$0 sps:$4 sm:$0xff]  }
 0x21f   : > { %2199 = vmatpush1.msra.mxu0 %v1980_v48  ;;  %v1296_v53 = vpop.permute.xlu0 %1295 }
 0x220   : > { %v1308_v56 = vsel %vm4473_vm0, %v3648_v51, %v1296_v53  ;;  %v4093_v59 = vpop.permute.xlu1 %1297 }
 0x221   : > { %1324 = vst [vmem:[#allocation3 + $0x338] sm:$0xf] %v1308_v56  ;;  %v1309_v4 = vsel %vm4474_vm1, %v1296_v53, %v4093_v59  ;;  %548 = vrot.lane.b32.xlu0 %v2838_v49, %s3071_s29 }
 0x222   : > { %1325 = vst [vmem:[#allocation3 + $0x230] sm:$0xf] %v1309_v4  ;;  %550 = vrot.lane.b32.xlu1 %v3837_v43, %s3071_s29 }
 0x223   : > { %v1354_v0 = vpop.permute.xlu0 %1353 }
 0x224   : > { %v1366_v51 = vsel %vm4475_vm2, %v3660_v57, %v1354_v0  ;;  %v4102_v28 = vpop.permute.xlu1 %1355  ;;  %v1998_v26 = vld [vmem:[#allocation3 + $0x308] sm:$0xff]  ;;  %vm4485_vm2 = vcmask 56320  }
 0x225   : > { %1382 = vst [vmem:[#allocation3 + $0x338] sm:$0xf0] %v1366_v51  ;;  %v1367_v3 = vsel %vm4476_vm3, %v1354_v0, %v4102_v28  ;;  %724 = vrot.lane.b32.xlu0 %v3907_v9, %s3066_s6  ;;  %v1999_v21 = vld [vmem:[#allocation3 + $0x290] sm:$0xff]  ;;  %vm4486_vm3 = vmmov %vm4485_vm2 }
 0x226   : > { %1383 = vst [vmem:[#allocation3 + $0x230] sm:$0xf0] %v1367_v3  ;;  %726 = vrot.lane.b32.xlu1 %v700_v60, %s3066_s6  ;;  %2265 = vmatprep.subr.mxu1 %v1999_v21 }
 0x227   : > { %2266 = vmatpush1.msra.mxu1 %v1998_v26  ;;  %v1530_v19 = vpop.permute.xlu0 %1529 }
 0x228   : > { %v1540_v57 = vsel %vm1533_vm6, %v4027_v17, %v1530_v19  ;;  %v1532_v13 = vpop.permute.xlu1 %1531 }
 0x229   : > { %1556 = vst [vmem:[#allocation3 + $0x2c8] sm:$0xf] %v1540_v57  ;;  %v1541_v55 = vsel %vm1533_vm6, %v1530_v19, %v1532_v13  ;;  %782 = vrot.lane.b32.xlu0 %v3825_v58, %s4472_s14  ;;  %vm4479_vm6 = vcmask 64512  }
 0x22a   : > { %1557 = vst [vmem:[#allocation3 + $0x70] sm:$0xf] %v1541_v55  ;;  %784 = vrot.lane.b32.xlu1 %v2828_v35, %s4472_s14 }
 0x22b   : > { %v1588_v42 = vpop.permute.xlu0 %1587 }
 0x22c   : > { %v1598_v38 = vsel %vm1591_vm7, %v4037_v22, %v1588_v42  ;;  %v1590_v7 = vpop.permute.xlu1 %1589  ;;  %v1972_v1 = vld [vmem:[#allocation3 + $0x338] sm:$0xff] }
 0x22d   : > { %1614 = vst [vmem:[#allocation3 + $0x2c8] sm:$0xf0] %v1598_v38  ;;  %v1599_v34 = vsel %vm1591_vm7, %v1588_v42, %v1590_v7  ;;  %433 = vrot.lane.b32.xlu0 %v2838_v49, %s3072_s3  ;;  %v1973_v17 = vld [vmem:[#allocation3 + $0x230] sm:$0xff]  ;;  %vm4480_vm7 = vmmov %vm4479_vm6 }
 0x22e   : > { %1615 = vst [vmem:[#allocation3 + $0x70] sm:$0xf0] %v1599_v34  ;;  %435 = vrot.lane.b32.xlu1 %v3837_v43, %s3072_s3  ;;  %2200 = vmatprep.subr.mxu0 %v1973_v17  ;;  %v2829_v43 = vld [vmem:[#allocation2 + $0x20] ss:$0 sps:$4 sm:$0xff]  }
 0x22f   : > { %2201 = vmatpush1.msra.mxu0 %v1972_v1  ;;  %v1181_v31 = vpop.permute.xlu0 %1180 }
 0x230   : > { %v1193_v44 = vsel %vm4477_vm4, %v3700_v25, %v1181_v31  ;;  %v4123_v22 = vpop.permute.xlu1 %1182  ;;  %vm4487_vm4 = vcmask 48128  }
 0x231   : > { %1209 = vst [vmem:[#allocation3 + $0x138] sm:$0xf] %v1193_v44  ;;  %v1194_v12 = vsel %vm4478_vm5, %v1181_v31, %v4123_v22  ;;  %609 = vrot.lane.b32.xlu0 %v3907_v9, %s3068_s22  ;;  %vm4488_vm5 = vmmov %vm4487_vm4 }
 0x232   : > { %1210 = vst [vmem:[#allocation3 + $0x2c0] sm:$0xf] %v1194_v12  ;;  %611 = vrot.lane.b32.xlu1 %v585_v32, %s3068_s22 }
 0x233   : > { %v1239_v54 = vpop.permute.xlu0 %1238 }
 0x234   : > { %v1251_v20 = vsel %vm4479_vm6, %v3709_v8, %v1239_v54  ;;  %v4132_v36 = vpop.permute.xlu1 %1240  ;;  %v1990_v25 = vld [vmem:[#allocation3 + $0x2c8] sm:$0xff]  ;;  %vm4489_vm6 = vcmask 220160  }
 0x235   : > { %1267 = vst [vmem:[#allocation3 + $0x138] sm:$0xf0] %v1251_v20  ;;  %v1252_v61 = vsel %vm4480_vm7, %v1239_v54, %v4132_v36  ;;  %667 = vrot.lane.b32.xlu0 %v3825_v58, %s3069_s15  ;;  %v1991_v50 = vld [vmem:[#allocation3 + $0x70] sm:$0xff]  ;;  %vm4490_vm7 = vmmov %vm4489_vm6 }
 0x236   : > { %1268 = vst [vmem:[#allocation3 + $0x2c0] sm:$0xf0] %v1252_v61  ;;  %669 = vrot.lane.b32.xlu1 %v2829_v43, %s3069_s15  ;;  %2267 = vmatprep.subr.mxu1 %v1991_v50 }
 0x237   : > { %2268 = vmatpush1.msra.mxu1 %v1990_v25  ;;  %v1415_v8 = vpop.permute.xlu0 %1414 }
 0x238   : > { %v1425_v62 = vsel %vm1418_vm8, %v4062_v41, %v1415_v8  ;;  %v1417_v14 = vpop.permute.xlu1 %1416 }
 0x239   : > { %1441 = vst [vmem:[#allocation3 + $0x160] sm:$0xf] %v1425_v62  ;;  %v1426_v48 = vsel %vm1418_vm8, %v1415_v8, %v1417_v14  ;;  %494 = vrot.lane.b32.xlu0 %v3907_v9, %s3070_s28  ;;  %v2831_v9 = vld [vmem:[#allocation2 + $0x20] ss:$0 sps:$4 sm:$0xff]   ;;  %vm4481_vm8 = vcmask 146432  }
 0x23a   : > { %1442 = vst [vmem:[#allocation3 + $0x60] sm:$0xf] %v1426_v48  ;;  %496 = vrot.lane.b32.xlu1 %v470_v23, %s3070_s28  ;;  %vm4482_vm0 = vmmov %vm4481_vm8  ;;  %s2479_s28 = scalar_lea.hbm %s4415_s4, %s2681_s2 }
 0x23b   : > { %v1473_v16 = vpop.permute.xlu0 %1472 }
 0x23c   : > { %v1483_v53 = vsel %vm1476_vm9, %v4072_v37, %v1473_v16  ;;  %v1475_v18 = vpop.permute.xlu1 %1474  ;;  %v1964_v56 = vld [vmem:[#allocation3 + $0x138] sm:$0xff] }
 0x23d   : > { %1499 = vst [vmem:[#allocation3 + $0x160] sm:$0xf0] %v1483_v53  ;;  %v1484_v41 = vsel %vm1476_vm9, %v1473_v16, %v1475_v18  ;;  %552 = vrot.lane.b32.xlu0 %v3825_v58, %s3071_s29  ;;  %v1965_v24 = vld [vmem:[#allocation3 + $0x2c0] sm:$0xff]  ;;  %vm4483_vm9 = vcmask 138240  }
 0x23e   : > { %1500 = vst [vmem:[#allocation3 + $0x60] sm:$0xf0] %v1484_v41  ;;  %554 = vrot.lane.b32.xlu1 %v2830_v27, %s3071_s29  ;;  %2202 = vmatprep.subr.mxu0 %v1965_v24  ;;  %vm4484_vm1 = vmmov %vm4483_vm9  ;;  %s2458_s29 = scalar_lea.sflag [#allocation6], %s3240_s0 }
 0x23f   : > { %2203 = vmatpush1.msra.mxu0 %v1964_v56  ;;  %v1066_v4 = vpop.permute.xlu0 %1065 }
 0x240   : > { %v1078_v49 = vsel %vm4481_vm8, %v3749_v52, %v1066_v4  ;;  %v4153_v37 = vpop.permute.xlu1 %1067  ;;  %vm4491_vm8 = vcmask 211968  }
 0x241   : > { %1094 = vst [vmem:[#allocation3 + $0x2e8] sm:$0xf] %v1078_v49  ;;  %v1079_v0 = vsel %vm4482_vm0, %v1066_v4, %v4153_v37  ;;  %437 = vrot.lane.b32.xlu0 %v3825_v58, %s3072_s3  ;;  %vm4492_vm0 = vmmov %vm4491_vm8 }
 0x242   : > { %1095 = vst [vmem:[#allocation3 + $0x208] sm:$0xf] %v1079_v0  ;;  %439 = vrot.lane.b32.xlu1 %v2831_v9, %s3072_s3  ;;  %s2481_s3 = sshll.u32 %s4270_s11, 4  ;;  %s2482_s3 = int_to_ptr.vmem [resolvable:$true] %s2481_s3 }
 0x243   : > { %v1124_v60 = vpop.permute.xlu0 %1123  ;;  %s2949_s6 = scalar_lea.vmem %s2482_s3, 1024  ;;  %p2956_p7 = scmp.lt.s32.totalorder %s2482_s3, %s2954_s24 }
 0x244   : > { %v1136_v51 = vsel %vm4483_vm9, %v3758_v39, %v1124_v60  ;;  %v4162_v26 = vpop.permute.xlu1 %1125  ;;  %v1982_v3 = vld [vmem:[#allocation3 + $0x160] sm:$0xff]  ;;  %vm4493_vm9 = vcmask 130048   ;;  %p2950_p8 = scmp.ne.s32.totalorder %s2482_s3, %s2949_s6  ;;  %p2957_p10 = scmp.lt.s32.totalorder %s2955_s7, %s2949_s6 }
 0x245   : > { %1152 = vst [vmem:[#allocation3 + $0x2e8] sm:$0xf0] %v1136_v51  ;;  %v1137_v52 = vsel %vm4484_vm1, %v1124_v60, %v4162_v26  ;;  %v1983_v21 = vld [vmem:[#allocation3 + $0x60] sm:$0xff]  ;;  %vm4494_vm1 = vmmov %vm4493_vm9 }
 0x246   : > { %1153 = vst [vmem:[#allocation3 + $0x208] sm:$0xf0] %v1137_v52  ;;  %2269 = vmatprep.subr.mxu1 %v1983_v21  ;;  %p2951_p9 = pnand %p2950_p8, %p3196_p12  ;;  %p2958_p13 = por %p2957_p10, %p2956_p7 }
 0x247   : > { %2270 = vmatpush1.msra.mxu1 %v1982_v3  ;;  %v1300_v35 = vpop.permute.xlu0 %1299 }
 0x248   : > { %v1310_v58 = vsel %vm4485_vm2, %v4093_v59, %v1300_v35  ;;  %v1302_v19 = vpop.permute.xlu1 %1301  ;;  %vm4495_vm2 = vcmask 64512   ;;  %p2952_p11 = pneg %p2951_p9 }
 0x249   : > { %1326 = vst [vmem:[#allocation3 + $0xc0] sm:$0xf] %v1310_v58  ;;  %v1311_v57 = vsel %vm4486_vm3, %v1300_v35, %v1302_v19  ;;  %vm4496_vm3 = vmmov %vm4495_vm2 }
 0x24a   : > { %1327 = vst [vmem:[#allocation3 + $0x128] sm:$0xf] %v1311_v57  ;;  %p2959_p0 = pnand %p2958_p13, %p2952_p11 }
 0x24b   : > { %v1358_v39 = vpop.permute.xlu0 %1357 }
 0x24c   : > { %v1368_v13 = vsel %vm4487_vm4, %v4102_v28, %v1358_v39  ;;  %v1360_v55 = vpop.permute.xlu1 %1359  ;;  %v1956_v42 = vld [vmem:[#allocation3 + $0x2e8] sm:$0xff]  ;;  %vm4497_vm4 = vcmask 867328  }
 0x24d   : > { %1384 = vst [vmem:[#allocation3 + $0xc0] sm:$0xf0] %v1368_v13  ;;  %v1369_v38 = vsel %vm4488_vm5, %v1358_v39, %v1360_v55  ;;  %v1957_v7 = vld [vmem:[#allocation3 + $0x208] sm:$0xff]  ;;  %vm4498_vm5 = vmmov %vm4497_vm4 }
 0x24e   : > { %1385 = vst [vmem:[#allocation3 + $0x128] sm:$0xf0] %v1369_v38  ;;  %2204 = vmatprep.subr.mxu0 %v1957_v7 }
 0x24f   : > { %2205 = vmatpush1.msra.mxu0 %v1956_v42  ;;  %v951_v1 = vpop.permute.xlu0 %950 }
 0x250   : > { %v963_v59 = vsel %vm4489_vm6, %v3788_v30, %v951_v1  ;;  %v4174_v34 = vpop.permute.xlu1 %952  ;;  %vm4499_vm6 = vcmask 228352  }
 0x251   : > { %979 = vst [vmem:[#allocation3 + $0x248] sm:$0xf] %v963_v59  ;;  %v964_v17 = vsel %vm4490_vm7, %v951_v1, %v4174_v34  ;;  %vm4500_vm7 = vmmov %vm4499_vm6 }
 0x252   : > { %980 = vst [vmem:[#allocation3 + $0x340] sm:$0xf] %v964_v17 }
 0x253   : > { %v1009_v28 = vpop.permute.xlu0 %1008 }
 0x254   : > { %v1021_v31 = vsel %vm4491_vm8, %v3798_v5, %v1009_v28  ;;  %v4180_v32 = vpop.permute.xlu1 %1010  ;;  %v1974_v44 = vld [vmem:[#allocation3 + $0xc0] sm:$0xff]  ;;  %vm4501_vm8 = vcmask 146432  }
 0x255   : > { %1037 = vst [vmem:[#allocation3 + $0x248] sm:$0xf0] %v1021_v31  ;;  %v1022_v12 = vsel %vm4492_vm0, %v1009_v28, %v4180_v32  ;;  %v1975_v43 = vld [vmem:[#allocation3 + $0x128] sm:$0xff]  ;;  %vm4502_vm0 = vmmov %vm4501_vm8 }
 0x256   : > { %1038 = vst [vmem:[#allocation3 + $0x340] sm:$0xf0] %v1022_v12  ;;  %2271 = vmatprep.subr.mxu1 %v1975_v43 }
 0x257   : > { %2272 = vmatpush1.msra.mxu1 %v1974_v44  ;;  %v1185_v30 = vpop.permute.xlu0 %1184 }
 0x258   : > { %v1195_v54 = vsel %vm4493_vm9, %v4123_v22, %v1185_v30  ;;  %v1187_v2 = vpop.permute.xlu1 %1186  ;;  %vm4503_vm9 = vcmask 138240  }
 0x259   : > { %1211 = vst [vmem:[#allocation3 + $0xe8] sm:$0xf] %v1195_v54  ;;  %v1196_v20 = vsel %vm4494_vm1, %v1185_v30, %v1187_v2  ;;  %vm4504_vm1 = vmmov %vm4503_vm9 }
 0x25a   : > { %1212 = vst [vmem:[#allocation3 + $0x1d8] sm:$0xf] %v1196_v20 }
 0x25b   : > { %v1243_v5 = vpop.permute.xlu0 %1242 }
 0x25c   : > { %v1253_v25 = vsel %vm4495_vm2, %v4132_v36, %v1243_v5  ;;  %v1245_v29 = vpop.permute.xlu1 %1244  ;;  %v1948_v61 = vld [vmem:[#allocation3 + $0x248] sm:$0xff]  ;;  %vm4505_vm2 = vcmask 875520  }
 0x25d   : > { %1269 = vst [vmem:[#allocation3 + $0xe8] sm:$0xf0] %v1253_v25  ;;  %v1254_v50 = vsel %vm4496_vm3, %v1243_v5, %v1245_v29  ;;  %v1949_v8 = vld [vmem:[#allocation3 + $0x340] sm:$0xff]  ;;  %vm4506_vm3 = vmmov %vm4505_vm2 }
 0x25e   : > { %1270 = vst [vmem:[#allocation3 + $0x1d8] sm:$0xf0] %v1254_v50  ;;  %2206 = vmatprep.subr.mxu0 %v1949_v8 }
 0x25f   : > { %2207 = vmatpush1.msra.mxu0 %v1948_v61  ;;  %v836_v23 = vpop.permute.xlu0 %835 }
 0x260   : > { %v848_v22 = vsel %vm4497_vm4, %v3839_v63, %v836_v23  ;;  %v4192_v62 = vpop.permute.xlu1 %837  ;;  %vm4507_vm4 = vcmask 220160  }
 0x261   : > { %864 = vst [vmem:[#allocation3 + $0x98] sm:$0xf] %v848_v22  ;;  %v849_v14 = vsel %vm4498_vm5, %v836_v23, %v4192_v62  ;;  %vm4508_vm5 = vmmov %vm4507_vm4 }
 0x262   : > { %865 = vst [vmem:[#allocation3 + $0xa0] sm:$0xf] %v849_v14 }
 0x263   : > { %v894_v36 = vpop.permute.xlu0 %893 }
 0x264   : > { %v906_v48 = vsel %vm4499_vm6, %v3849_v6, %v894_v36  ;;  %v4198_v27 = vpop.permute.xlu1 %895  ;;  %v1966_v16 = vld [vmem:[#allocation3 + $0xe8] sm:$0xff]  ;;  %vm4509_vm6 = vcmask 211968  }
 0x265   : > { %922 = vst [vmem:[#allocation3 + $0x98] sm:$0xf0] %v906_v48  ;;  %v907_v53 = vsel %vm4500_vm7, %v894_v36, %v4198_v27  ;;  %v1967_v18 = vld [vmem:[#allocation3 + $0x1d8] sm:$0xff]  ;;  %vm4510_vm7 = vmmov %vm4509_vm6 }
 0x266   : > { %923 = vst [vmem:[#allocation3 + $0xa0] sm:$0xf0] %v907_v53  ;;  %2273 = vmatprep.subr.mxu1 %v1967_v18 }
 0x267   : > { %2274 = vmatpush1.msra.mxu1 %v1966_v16  ;;  %v1070_v63 = vpop.permute.xlu0 %1069 }
 0x268   : > { %v1080_v56 = vsel %vm4501_vm8, %v4153_v37, %v1070_v63  ;;  %v1072_v41 = vpop.permute.xlu1 %1071  ;;  %vm4511_vm8 = vcmask 867328  }
 0x269   : > { %1096 = vst [vmem:[#allocation3 + $0x2f8] sm:$0xf] %v1080_v56  ;;  %v1081_v24 = vsel %vm4502_vm0, %v1070_v63, %v1072_v41  ;;  %vm4512_vm0 = vmmov %vm4511_vm8 }
 0x26a   : > { %1097 = vst [vmem:[#allocation3 + $0x268] sm:$0xf] %v1081_v24 }
 0x26b   : > { %v1128_v6 = vpop.permute.xlu0 %1127 }
 0x26c   : > { %v1138_v9 = vsel %vm4503_vm9, %v4162_v26, %v1128_v6  ;;  %v1130_v4 = vpop.permute.xlu1 %1129  ;;  %v1940_v49 = vld [vmem:[#allocation3 + $0x98] sm:$0xff]  ;;  %vm4513_vm9 = vcmask 228352  }
 0x26d   : > { %1154 = vst [vmem:[#allocation3 + $0x2f8] sm:$0xf0] %v1138_v9  ;;  %v1139_v0 = vsel %vm4504_vm1, %v1128_v6, %v1130_v4  ;;  %v1941_v60 = vld [vmem:[#allocation3 + $0xa0] sm:$0xff]  ;;  %vm4514_vm1 = vmmov %vm4513_vm9 }
 0x26e   : > { %1155 = vst [vmem:[#allocation3 + $0x268] sm:$0xf0] %v1139_v0  ;;  %2208 = vmatprep.subr.mxu0 %v1941_v60 }
 0x26f   : > { %2209 = vmatpush1.msra.mxu0 %v1940_v49  ;;  %v721_v51 = vpop.permute.xlu0 %720 }
 0x270   : > { %v733_v37 = vsel %vm728_vm15, %v3879_v40, %v721_v51  ;;  %v4210_v3 = vpop.permute.xlu1 %722 }
 0x271   : > { %749 = vst [vmem:[#allocation3 + $0xe0] sm:$0xf] %v733_v37  ;;  %v734_v52 = vsel %vm728_vm15, %v721_v51, %v4210_v3 }
 0x272   : > { %750 = vst [vmem:[#allocation3 + $0x130] sm:$0xf] %v734_v52 }
 0x273   : > { %v779_v26 = vpop.permute.xlu0 %778 }
 0x274   : > { %v791_v21 = vsel %vm4505_vm2, %v3888_v15, %v779_v26  ;;  %v4216_v35 = vpop.permute.xlu1 %780  ;;  %v1958_v58 = vld [vmem:[#allocation3 + $0x2f8] sm:$0xff] }
 0x275   : > { %807 = vst [vmem:[#allocation3 + $0xe0] sm:$0xf0] %v791_v21  ;;  %v792_v19 = vsel %vm4506_vm3, %v779_v26, %v4216_v35  ;;  %v1959_v57 = vld [vmem:[#allocation3 + $0x268] sm:$0xff]  ;;  %vm4515_vm3 = vmmov %vm4505_vm2 }
 0x276   : > { %808 = vst [vmem:[#allocation3 + $0x130] sm:$0xf0] %v792_v19  ;;  %2275 = vmatprep.subr.mxu1 %v1959_v57 }
 0x277   : > { %2276 = vmatpush1.msra.mxu1 %v1958_v58  ;;  %v955_v40 = vpop.permute.xlu0 %954 }
 0x278   : > { %v965_v39 = vsel %vm4507_vm4, %v4174_v34, %v955_v40  ;;  %v957_v13 = vpop.permute.xlu1 %956 }
 0x279   : > { %981 = vst [vmem:[#allocation3 + $0x2a8] sm:$0xf] %v965_v39  ;;  %v966_v55 = vsel %vm4508_vm5, %v955_v40, %v957_v13 }
 0x27a   : > { %982 = vst [vmem:[#allocation3 + $0x310] sm:$0xf] %v966_v55 }
 0x27b   : > { %v1013_v15 = vpop.permute.xlu0 %1012 }
 0x27c   : > { %v1023_v42 = vsel %vm4509_vm6, %v4180_v32, %v1013_v15  ;;  %v1015_v38 = vpop.permute.xlu1 %1014  ;;  %v1932_v7 = vld [vmem:[#allocation3 + $0xe0] sm:$0xff] }
 0x27d   : > { %1039 = vst [vmem:[#allocation3 + $0x2a8] sm:$0xf0] %v1023_v42  ;;  %v1024_v1 = vsel %vm4510_vm7, %v1013_v15, %v1015_v38  ;;  %v1933_v59 = vld [vmem:[#allocation3 + $0x130] sm:$0xff] }
 0x27e   : > { %1040 = vst [vmem:[#allocation3 + $0x310] sm:$0xf0] %v1024_v1  ;;  %2210 = vmatprep.subr.mxu0 %v1933_v59 }
 0x27f   : > { %2211 = vmatpush1.msra.mxu0 %v1932_v7  ;;  %v606_v17 = vpop.permute.xlu0 %605 }
 0x280   : > { %v618_v34 = vsel %vm613_vm10, %v3915_v10, %v606_v17  ;;  %v4228_v28 = vpop.permute.xlu1 %607 }
 0x281   : > { %634 = vst [vmem:[#allocation3 + $0x1a8] sm:$0xf] %v618_v34  ;;  %v619_v31 = vsel %vm613_vm10, %v606_v17, %v4228_v28 }
 0x282   : > { %635 = vst [vmem:[#allocation3 + $0x158] sm:$0xf] %v619_v31 }
 0x283   : > { %v664_v32 = vpop.permute.xlu0 %663 }
 0x284   : > { %v676_v44 = vsel %vm671_vm11, %v3924_v33, %v664_v32  ;;  %v4234_v12 = vpop.permute.xlu1 %665  ;;  %v1950_v43 = vld [vmem:[#allocation3 + $0x2a8] sm:$0xff] }
 0x285   : > { %692 = vst [vmem:[#allocation3 + $0x1a8] sm:$0xf0] %v676_v44  ;;  %v677_v30 = vsel %vm671_vm11, %v664_v32, %v4234_v12  ;;  %v1951_v54 = vld [vmem:[#allocation3 + $0x310] sm:$0xff] }
 0x286   : > { %693 = vst [vmem:[#allocation3 + $0x158] sm:$0xf0] %v677_v30  ;;  %2277 = vmatprep.subr.mxu1 %v1951_v54 }
 0x287   : > { %2278 = vmatpush1.msra.mxu1 %v1950_v43  ;;  %v840_v10 = vpop.permute.xlu0 %839 }
 0x288   : > { %v850_v2 = vsel %vm4511_vm8, %v4192_v62, %v840_v10  ;;  %v842_v20 = vpop.permute.xlu1 %841 }
 0x289   : > { %866 = vst [vmem:[#allocation3 + $0x320] sm:$0xf] %v850_v2  ;;  %v851_v5 = vsel %vm4512_vm0, %v840_v10, %v842_v20 }
 0x28a   : > { %867 = vst [vmem:[#allocation3 + $0xf0] sm:$0xf] %v851_v5 }
 0x28b   : > { %v898_v33 = vpop.permute.xlu0 %897 }
 0x28c   : > { %v908_v25 = vsel %vm4513_vm9, %v4198_v27, %v898_v33  ;;  %v900_v29 = vpop.permute.xlu1 %899  ;;  %v1924_v61 = vld [vmem:[#allocation3 + $0x1a8] sm:$0xff] }
 0x28d   : > { %924 = vst [vmem:[#allocation3 + $0x320] sm:$0xf0] %v908_v25  ;;  %v909_v50 = vsel %vm4514_vm1, %v898_v33, %v900_v29  ;;  %v1925_v8 = vld [vmem:[#allocation3 + $0x158] sm:$0xff]  ;;  %v2839_v33 = vld [vmem:[#allocation9] sm:$0xff]  ;;  %v2338_v25 = vlaneseq }
 0x28e   : > { %925 = vst [vmem:[#allocation3 + $0xf0] sm:$0xf0] %v909_v50  ;;  %2212 = vmatprep.subr.mxu0 %v1925_v8  ;;  %v2336_v8 = vld [vmem:[#allocation10] sm:$0xff] }
 0x28f   : > { %2213 = vmatpush1.msra.mxu0 %v1924_v61  ;;  %v491_v23 = vpop.permute.xlu0 %490  ;;  %v2339_v29 = vshrl.u32 %v2338_v25, 7 }
 0x290   : > { %v503_v22 = vsel %vm498_vm12, %v3934_v11, %v491_v23  ;;  %v4246_v62 = vpop.permute.xlu1 %492 }
 0x291   : > { %519 = vst [vmem:[#allocation3 + $0x148] sm:$0xf] %v503_v22  ;;  %v504_v14 = vsel %vm498_vm12, %v491_v23, %v4246_v62  ;;  %v2340_v61 = vsub.s32 0, %v2339_v29  ;;  %v2344_v50 = vsub.s32 1, %v2339_v29 }
 0x292   : > { %520 = vst [vmem:[#allocation3 + $0x100] sm:$0xf] %v504_v14 }
 0x293   : > { %v549_v36 = vpop.permute.xlu0 %548  ;;  %v4301_v23 = vrot.slane %v2336_v8, %v2340_v61  ;;  %v4303_v22 = vrot.slane %v2336_v8, %v2344_v50 }
 0x294   : > { %v561_v48 = vsel %vm556_vm13, %v3944_v45, %v549_v36  ;;  %v4252_v27 = vpop.permute.xlu1 %550  ;;  %v1942_v16 = vld [vmem:[#allocation3 + $0x320] sm:$0xff] }
 0x295   : > { %577 = vst [vmem:[#allocation3 + $0x148] sm:$0xf0] %v561_v48  ;;  %v562_v53 = vsel %vm556_vm13, %v549_v36, %v4252_v27  ;;  %v1943_v18 = vld [vmem:[#allocation3 + $0xf0] sm:$0xff] }
 0x296   : > { %578 = vst [vmem:[#allocation3 + $0x100] sm:$0xf0] %v562_v53  ;;  %2279 = vmatprep.subr.mxu1 %v1943_v18 }
 0x297   : > { %2280 = vmatpush1.msra.mxu1 %v1942_v16  ;;  %v725_v11 = vpop.permute.xlu0 %724 }
 0x298   : > { %v735_v63 = vsel %vm728_vm15, %v4210_v3, %v725_v11  ;;  %v727_v56 = vpop.permute.xlu1 %726 }
 0x299   : > { %751 = vst [vmem:[#allocation3 + $0x1e8] sm:$0xf] %v735_v63  ;;  %v736_v45 = vsel %vm728_vm15, %v725_v11, %v727_v56  ;;  %v2356_v56 = vsub.s32 4, %v2339_v29 }
 0x29a   : > { %752 = vst [vmem:[#allocation3 + $0x38] sm:$0xf] %v736_v45 }
 0x29b   : > { %v783_v41 = vpop.permute.xlu0 %782  ;;  %v4317_v45 = vrot.slane %v2336_v8, %v2356_v56 }
 0x29c   : > { %v793_v24 = vsel %vm4505_vm2, %v4216_v35, %v783_v41  ;;  %v785_v6 = vpop.permute.xlu1 %784  ;;  %v1916_v9 = vld [vmem:[#allocation3 + $0x148] sm:$0xff] }
 0x29d   : > { %809 = vst [vmem:[#allocation3 + $0x1e8] sm:$0xf0] %v793_v24  ;;  %v794_v4 = vsel %vm4515_vm3, %v783_v41, %v785_v6  ;;  %v1917_v49 = vld [vmem:[#allocation3 + $0x100] sm:$0xff]  ;;  %v2360_v41 = vsub.s32 5, %v2339_v29 }
 0x29e   : > { %810 = vst [vmem:[#allocation3 + $0x38] sm:$0xf0] %v794_v4  ;;  %2214 = vmatprep.subr.mxu0 %v1917_v49 }
 0x29f   : > { %2215 = vmatpush1.msra.mxu0 %v1916_v9  ;;  %v434_v0 = vpop.permute.xlu0 %433  ;;  %v4319_v6 = vrot.slane %v2336_v8, %v2360_v41  ;;  %v2364_v9 = vsub.s32 6, %v2339_v29 }
 0x2a0   : > { %v446_v60 = vsel %vm441_vm14, %v3968_v46, %v434_v0  ;;  %v436_v51 = vpop.permute.xlu1 %435 }
 0x2a1   : > { %462 = vst [vmem:[#allocation3 + $0x360] sm:$0xf0] %v446_v60  ;;  %v447_v37 = vsel %vm441_vm14, %v434_v0, %v436_v51  ;;  %v4323_v0 = vrot.slane %v2336_v8, %v2364_v9  ;;  %v2368_v60 = vsub.s32 7, %v2339_v29 }
 0x2a2   : > { %463 = vst [vmem:[#allocation3 + $0x328] sm:$0xf0] %v447_v37 }
 0x2a3   : > { %v610_v3 = vpop.permute.xlu0 %609  ;;  %v4266_v52 = vpop.f32.mrf.mxu0 }
 0x2a4   : > { %v620_v26 = vsel %vm613_vm10, %v4228_v28, %v610_v3  ;;  %v612_v21 = vpop.permute.xlu1 %611  ;;  %v1934_v35 = vld [vmem:[#allocation3 + $0x1e8] sm:$0xff]  ;;  %2328 = vst [vmem:[%s4270_s11] sm:$0xff] %v4266_v52 }
 0x2a5   : > { %636 = vst [vmem:[#allocation3 + $0x2e0] sm:$0xf] %v620_v26  ;;  %v621_v46 = vsel %vm613_vm10, %v610_v3, %v612_v21  ;;  %v1935_v58 = vld [vmem:[#allocation3 + $0x38] sm:$0xff]  ;;  %v4275_v19 = vpop.f32.mrf.mxu0  ;;  %vm2378_vm10 = vcmask 1040384   ;;  %v4327_v3 = vrot.slane %v2336_v8, %v2368_v60 }
 0x2a6   : > { %637 = vst [vmem:[#allocation3 + $0x278] sm:$0xf] %v621_v46  ;;  %2281 = vmatprep.subr.mxu1 %v1935_v58  ;;  %2329 = vst [vmem:[%s4270_s11 + $0x8] sm:$0xff] %v4275_v19  ;;  %v2379_v14 = vsel %vm2378_vm10, %v4301_v23, 0.0  ;;  %v2380_v36 = vsel %vm2378_vm10, %v4303_v22, 0.0  ;;  %v2386_v4 = vsel %vm2378_vm10, %v4317_v45, 0.0 }
 0x2a7   : > { %2282 = vmatpush1.msra.mxu1 %v1934_v35  ;;  %v668_v57 = vpop.permute.xlu0 %667  ;;  %v2381_v16 = vadd.f32 %v2380_v36, %v2379_v14  ;;  %v2390_v26 = vsel %vm2378_vm10, %v4323_v0, 0.0  ;;  %v2392_v35 = vsel %vm2378_vm10, %v4327_v3, 0.0 }
 0x2a8   : > { %v678_v40 = vsel %vm671_vm11, %v4234_v12, %v668_v57  ;;  %v670_v39 = vpop.permute.xlu1 %669  ;;  %v1908_v13 = vld [vmem:[#allocation3 + $0x360] sm:$0xff] }
 0x2a9   : > { %694 = vst [vmem:[#allocation3 + $0x2e0] sm:$0xf0] %v678_v40  ;;  %v679_v55 = vsel %vm671_vm11, %v668_v57, %v670_v39  ;;  %v1909_v15 = vld [vmem:[#allocation3 + $0x328] sm:$0xff]  ;;  %v2396_v40 = vmul.f32 %v4301_v23, %v4266_v52  ;;  %v2397_v39 = vmul.f32 %v4303_v22, %v4275_v19  ;;  %vm2453_vm11 = vcmask 7168  }
 0x2aa   : > { %695 = vst [vmem:[#allocation3 + $0x278] sm:$0xf0] %v679_v55  ;;  %2216 = vmatprep.subr.mxu0 %v1909_v15 }
 0x2ab   : > { %2217 = vmatpush1.msra.mxu0 %v1908_v13  ;;  %v495_v42 = vpop.permute.xlu0 %494  ;;  %v2404_v13 = vadd.f32 %v2397_v39, %v2396_v40 }
 0x2ac   : > { %v505_v38 = vsel %vm498_vm12, %v4246_v62, %v495_v42  ;;  %v497_v7 = vpop.permute.xlu1 %496  ;;  %2672 = vmatmul.mubr.msk.f32.vlgmr.msra.gmra.mxu0 %vm728_vm15, %v3946_v47  ;;  %v2348_v62 = vsub.s32 2, %v2339_v29 }
 0x2ad   : > { %521 = vst [vmem:[#allocation3 + $0x58] sm:$0xf] %v505_v38  ;;  %v506_v1 = vsel %vm498_vm12, %v495_v42, %v497_v7 }
 0x2ae   : > { %522 = vst [vmem:[#allocation3 + $0x2d8] sm:$0xf] %v506_v1  ;;  %v4309_v48 = vrot.slane %v2336_v8, %v2348_v62 }
 0x2af   : > { %v553_v59 = vpop.permute.xlu0 %552 }
 0x2b0   : > { %v563_v17 = vsel %vm556_vm13, %v4252_v27, %v553_v59  ;;  %v555_v34 = vpop.permute.xlu1 %554  ;;  %v1926_v28 = vld [vmem:[#allocation3 + $0x2e0] sm:$0xff]  ;;  %v2352_v27 = vsub.s32 3, %v2339_v29  ;;  %v2382_v53 = vsel %vm2378_vm10, %v4309_v48, 0.0 }
 0x2b1   : > { %579 = vst [vmem:[#allocation3 + $0x58] sm:$0xf0] %v563_v17  ;;  %v564_v31 = vsel %vm556_vm13, %v553_v59, %v555_v34  ;;  %v1927_v32 = vld [vmem:[#allocation3 + $0x278] sm:$0xff]  ;;  %v2383_v11 = vadd.f32 %v2382_v53, %v2381_v16 }
 0x2b2   : > { %580 = vst [vmem:[#allocation3 + $0x2d8] sm:$0xf0] %v564_v31  ;;  %2283 = vmatprep.subr.mxu1 %v1927_v32  ;;  %v4313_v18 = vrot.slane %v2336_v8, %v2352_v27 }
 0x2b3   : > { %2284 = vmatpush1.msra.mxu1 %v1926_v28  ;;  %v438_v47 = vpop.permute.xlu0 %437 }
 0x2b4   : > { %v448_v44 = vsel %vm441_vm14, %v436_v51, %v438_v47  ;;  %v440_v12 = vpop.permute.xlu1 %439  ;;  %v4291_v43 = vpop.f32.mrf.mxu1  ;;  %v2384_v63 = vsel %vm2378_vm10, %v4313_v18, 0.0  ;;  %v2388_v51 = vsel %vm2378_vm10, %v4319_v6, 0.0 }
 0x2b5   : > { %464 = vst [vmem:[#allocation3 + $0x40] sm:$0xf0] %v448_v44  ;;  %v449_v30 = vsel %vm441_vm14, %v438_v47, %v440_v12  ;;  %2330 = vst [vmem:[%s4270_s11 + $0x10] sm:$0xff] %v4291_v43  ;;  %v2385_v24 = vadd.f32 %v2384_v63, %v2383_v11  ;;  %v2398_v55 = vmul.f32 %v4309_v48, %v4291_v43 }
 0x2b6   : > { %465 = vst [vmem:[#allocation3 + $0x378] sm:$0xf0] %v449_v30  ;;  %v4296_v54 = vpop.f32.mrf.mxu1 }
 0x2b7   : > { %2331 = vst [vmem:[%s4270_s11 + $0x18] sm:$0xff] %v4296_v54  ;;  %v2387_v49 = vadd.f32 %v2386_v4, %v2385_v24  ;;  %v2405_v15 = vadd.f32 %v2404_v13, %v2398_v55  ;;  %v2399_v42 = vmul.f32 %v4313_v18, %v4296_v54 }
 0x2b8   : > { %v1918_v10 = vld [vmem:[#allocation3 + $0x58] sm:$0xff] }
 0x2b9   : > { %v1919_v2 = vld [vmem:[#allocation3 + $0x2d8] sm:$0xff]  ;;  %v2389_v37 = vadd.f32 %v2388_v51, %v2387_v49  ;;  %v2406_v7 = vadd.f32 %v2405_v15, %v2399_v42 }
 0x2ba   : > { %2285 = vmatprep.subr.mxu1 %v1919_v2 }
 0x2bb   : > { %2286 = vmatpush1.msra.mxu1 %v1918_v10  ;;  %v2391_v21 = vadd.f32 %v2390_v26, %v2389_v37 }
 0x2bc   : > { %v1910_v20 = vld [vmem:[#allocation3 + $0x40] sm:$0xff] }
 0x2bd   : > { %v1911_v5 = vld [vmem:[#allocation3 + $0x378] sm:$0xff]  ;;  %v2393_v46 = vadd.f32 %v2392_v35, %v2391_v21 }
 0x2be   : > { %2287 = vmatprep.subr.mxu1 %v1911_v5 }
 0x2bf   : > { %2288 = vmatpush1.msra.mxu1 %v1910_v20  ;;  %2394 = vadd.xlane.f32.xlu0 %v2393_v46 }
 0x2c0   : > { %2675 = vmatmul.mubr.msk.f32.vlgmr.msra.gmra.mxu1 %vm728_vm15, %v2839_v33 }
 0x348   : > { %v2395_v12 = vpop.xlane.xlu0 %2394 }
 0x349   : > { %v2413_v30 = vmax.f32 %v2395_v12, 1.0 }
 0x34b   : > { %v2417_v10 = vrot.slane %v2413_v30, %v2340_v61 }
 0x34d   : > { %2834 = vrcp.f32 %v2417_v10 }
 0x35a   : > { %v2835_v2 = vpop.eup %2834 }
 0x36c   : > { %v2252_v58 = vpop.f32.mrf.mxu0 }
 0x36d   : > { %2332 = vst [vmem:[%s4270_s11 + $0x20] sm:$0xff] %v2252_v58  ;;  %v2400_v38 = vmul.f32 %v4317_v45, %v2252_v58 }
 0x36e   : > { %v2254_v57 = vpop.f32.mrf.mxu0 }
 0x36f   : > { %2333 = vst [vmem:[%s4270_s11 + $0x28] sm:$0xff] %v2254_v57  ;;  %v2407_v1 = vadd.f32 %v2406_v7, %v2400_v38  ;;  %v2401_v59 = vmul.f32 %v4319_v6, %v2254_v57 }
 0x371   : > { %v2408_v34 = vadd.f32 %v2407_v1, %v2401_v59 }
 0x380   : > { %v2323_v17 = vpop.f32.mrf.mxu1 }
 0x381   : > { %2334 = vst [vmem:[%s4270_s11 + $0x30] sm:$0xff] %v2323_v17  ;;  %v2402_v28 = vmul.f32 %v4323_v0, %v2323_v17 }
 0x382   : > { %v2325_v31 = vpop.f32.mrf.mxu1 }
 0x383   : > { %v2409_v32 = vadd.f32 %v2408_v34, %v2402_v28  ;;  %2335 = vst [vmem:[%s4270_s11 + $0x38] sm:$0xff] %v2325_v31  ;;  %v2403_v47 = vmul.f32 %v4327_v3, %v2325_v31 }
 0x385   : > { %v2410_v44 = vadd.f32 %v2409_v32, %v2403_v47 }
 0x387   : > { %2411 = vadd.xlane.f32.xlu1 %v2410_v44 }
 0x410   : > { %v2412_v20 = vpop.xlane.xlu1 %2411 }
 0x411   : > { %v2419_v5 = vmul.f32 %v2835_v2, %v2412_v20  ;;  %2454 = vst.msk [vmem:[%s4354_s10] sm:$0xff] %vm2453_vm11, %v2412_v20 }
 0x413   : > { %v2420_v33 = vsub.f32 %v4266_v52, %v2419_v5  ;;  %v2421_v25 = vsub.f32 %v4275_v19, %v2419_v5  ;;  %v2422_v29 = vsub.f32 %v4291_v43, %v2419_v5  ;;  %v2423_v61 = vsub.f32 %v4296_v54, %v2419_v5 }
 0x414   : > { %v2424_v50 = vsub.f32 %v2252_v58, %v2419_v5  ;;  %v2425_v36 = vsub.f32 %v2254_v57, %v2419_v5  ;;  %v2426_v11 = vsub.f32 %v2323_v17, %v2419_v5  ;;  %v2427_v43 = vsub.f32 %v2325_v31, %v2419_v5 }
 0x415   : > { %v2428_v8 = vmul.f32 %v2420_v33, %v4301_v23  ;;  %v2429_v62 = vmul.f32 %v2421_v25, %v4303_v22  ;;  %v2430_v14 = vmul.f32 %v2422_v29, %v4309_v48  ;;  %v2431_v27 = vmul.f32 %v2423_v61, %v4313_v18 }
 0x416   : > { %v2432_v52 = vmul.f32 %v2424_v50, %v4317_v45  ;;  %v2433_v54 = vmul.f32 %v2425_v36, %v4319_v6  ;;  %v2434_v22 = vmul.f32 %v2426_v11, %v4323_v0  ;;  %v2435_v18 = vmul.f32 %v2427_v43, %v4327_v3 }
 0x417   : > { %v2436_v16 = vmul.f32 %v2428_v8, %v2428_v8  ;;  %v2437_v53 = vmul.f32 %v2429_v62, %v2429_v62  ;;  %v2438_v19 = vmul.f32 %v2430_v14, %v2430_v14  ;;  %v2439_v23 = vmul.f32 %v2431_v27, %v2431_v27 }
 0x418   : > { %v2440_v48 = vmul.f32 %v2432_v52, %v2432_v52  ;;  %v2441_v24 = vmul.f32 %v2433_v54, %v2433_v54  ;;  %v2442_v45 = vmul.f32 %v2434_v22, %v2434_v22  ;;  %v2443_v49 = vmul.f32 %v2435_v18, %v2435_v18 }
 0x419   : > { %v2444_v63 = vadd.f32 %v2437_v53, %v2436_v16 }
 0x41b   : > { %v2445_v56 = vadd.f32 %v2444_v63, %v2438_v19 }
 0x41d   : > { %v2446_v41 = vadd.f32 %v2445_v56, %v2439_v23 }
 0x41f   : > { %v2447_v9 = vadd.f32 %v2446_v41, %v2440_v48 }
 0x421   : > { %v2448_v4 = vadd.f32 %v2447_v9, %v2441_v24 }
 0x423   : > { %v2449_v60 = vadd.f32 %v2448_v4, %v2442_v45 }
 0x425   : > { %v2450_v51 = vadd.f32 %v2449_v60, %v2443_v49 }
 0x427   : > { %2451 = vadd.xlane.f32.xlu0 %v2450_v51 }
 0x428   : > { %2962 = shalt.err (!%p2959_p0)
}
 0x429   : > { %s2963_s21 = scalar_lea.hbm %s2479_s28, 1024  ;;  %s2967_s13 = scalar_lea.hbm %s4415_s4, 2048 }
 0x42a   : > { %p2964_p5 = scmp.ne.s32.totalorder %s2479_s28, %s2963_s21  ;;  %p2968_p2 = scmp.lt.s32.totalorder %s2479_s28, %s4415_s4 }
 0x42b   : > { %p2969_p4 = scmp.lt.s32.totalorder %s2967_s13, %s2963_s21 }
 0x42c   : > { %p2965_p3 = pnand %p2964_p5, %p3196_p12 }
 0x42d   : > { %p2970_p6 = por %p2969_p4, %p2968_p2 }
 0x42e   : > { %p2966_p1 = pneg %p2965_p3 }
 0x430   : > { %p2971_p8 = pnand %p2970_p6, %p2966_p1 }
 0x432   : > { %2974 = shalt.err (!%p2971_p8)
}
 0x433   : > { %2695 = dma.vmem_to_hbm [thread:$0]  (%p3196_p12), %s2482_s3, 1024, %s2479_s28, %s2458_s29   ;;  %vm2455_vm12 = vcmask 15368  }
 0x4b0   : > { %v2452_v6 = vpop.xlane.xlu0 %2451 }
 0x4b1   : > { %2456 = vst.msk [vmem:[%s4354_s10] sm:$0xff] %vm2455_vm12, %v2452_v6 }
 0x4b2 PF: > { %s2496_s11 = sand.u32 1, %s3021_s18   ;;  %p4516_p9 = scmp.ne.s32.totalorder %s4450_s27, 0 }
 0x4b3   : > { %p4517_p11 = scmp.ge.s32.totalorder %s3041_s23, 2  ;;  %s2497_s30 = scalar_lea.sflag [#allocation6], %s2496_s11 }
 0x4b5   : > { %p2712_p7 = pnand %p4517_p11, %p4516_p9 }
 0x4b7   : > { %p2713_p10 = pneg %p2712_p7 }
 0x4b9   : > { %3016 = dma.done.wait (%p2713_p10), %s2497_s30, 1024  }
 0x4ba   : > { %3018 = vsyncadd (%p2713_p10), %s2497_s30, 4294966272  ;;  %s26_s23 = sadd.s32 1, %s3041_s23   ;;  %s4518_s17 = sld [smem:[#allocation20_spill]] }
 0x4bb   : > { %p23_p13 = scmp.ge.s32.totalorder %s26_s23, 4   ;;  %s4519_s21 = sld [smem:[#allocation18_spill]] }
 0x4bc   : > { %s4520_s22 = sld [smem:[#allocation19_spill]]  ;;  %s4521_s18 = smov %s3025_s19 }
 0x4bd   : > { %s4522_s19 = smov %s3029_s20  ;;  %25 = sbr.rel (!%p23_p13) target bundleno = 13 (0xd), region = 115 }
 0x4c0   : > { %s4523_s20 = smov %s4518_s17 }
 0x4c2   :  { %2512 = vsyncpa [#allocation5], 1 }
 0x4c3   :  { %2514 = vsyncpa [#allocation5 + $0x1], 1 }
 0x4c4   :  { %2515 = vsyncpa [#allocation8], 1 }
 0x4c5   :  { %2517 = vsyncpa [#allocation8 + $0x1], 1 }
 0x4c6   :  { %2518 = vsyncpa [#allocation11], 1 }
 0x4c7   :  { %2519 = vsyncpa [#allocation6], 1 }
 0x4c8   :  { %2521 = vsyncpa [#allocation6 + $0x1], 1 }

</bundles_post_ra>
